<compile_context>
chip_gen: v7x
topology: tpu7x:2x2x1
jax: 0.10.0
libtpu: 0.0.40
codegen_flags: <defaults>
</compile_context>

<pallas_src>
import functools

import jax
import jax.numpy as jnp
from jax.experimental import pallas as pl
from jax.experimental.pallas import tpu as pltpu


# ----------------------------------------------------------------------------
# Fused BasicBlock kernel (one grid step == one image)
# ----------------------------------------------------------------------------
def _basic_block_kernel(*refs, down_sample):
    if down_sample:
        (x_ref, w1_ref, s1_ref, w2_ref, s2_ref, wd_ref, sd_ref,
         out_ref, hpad_ref) = refs
    else:
        (x_ref, w1_ref, s1_ref, w2_ref, s2_ref, out_ref, hpad_ref) = refs

    _, Ho, Wo, Cout = out_ref.shape
    Cin = w1_ref.shape[1] // 3
    M = Ho * Wo

    # ---- conv1 (3x3, stride 1 or 2) + bn1 (scale folded into w1) + ReLU ----
    # One MXU matmul per kernel row kh: the 3 kw-tap windows are concatenated
    # along the channel axis -> K = 3*Cin.
    acc1 = None
    identity = None
    for kh in range(3):
        if down_sample:
            # Parity-plane trick: output (i, j), tap (kh, kw) reads
            # x_pad[2i+kh, 2j+kw] == plane(kh%2, kw%2)[i + kh//2, j + kw//2],
            # i.e. a unit-stride window of one plane (no strided loads).
            wins = []
            for kw in range(3):
                p = (kh % 2) * 2 + (kw % 2)
                wins.append(
                    x_ref[0, p, kh // 2:kh // 2 + Ho, kw // 2:kw // 2 + Wo, :])
        else:
            wins = [x_ref[0, kh:kh + Ho, kw:kw + Wo, :] for kw in range(3)]
        slab = jnp.concatenate(wins, axis=-1).reshape(M, 3 * Cin)
        d = jnp.dot(slab, w1_ref[kh], preferred_element_type=jnp.float32)
        acc1 = d if acc1 is None else acc1 + d
        if kh == 1:
            # The (kh=1, kw=1) window is exactly the shortcut's input: the
            # (odd, odd) parity plane for stride 2, the unpadded image for
            # stride 1.  Reuse it (no second window materialization).
            mid = wins[1].reshape(M, Cin)
            if down_sample:
                identity = (jnp.dot(mid, wd_ref[...],
                                    preferred_element_type=jnp.float32)
                            + sd_ref[...])
            else:
                identity = mid.astype(jnp.float32)
    h = jnp.maximum(acc1 + s1_ref[...], 0.0)

    # Stage conv1's output in a zero-padded bf16 VMEM scratch (no HBM
    # round-trip between the two convs).  Only the 1-pixel border is zeroed
    # each step; the interior is fully overwritten below.
    zr = jnp.zeros((1, Wo + 2, Cout), hpad_ref.dtype)
    zc = jnp.zeros((Ho, 1, Cout), hpad_ref.dtype)
    hpad_ref[0:1, :, :] = zr
    hpad_ref[Ho + 1:Ho + 2, :, :] = zr
    hpad_ref[1:Ho + 1, 0:1, :] = zc
    hpad_ref[1:Ho + 1, Wo + 1:Wo + 2, :] = zc
    hpad_ref[1:Ho + 1, 1:Wo + 1, :] = (
        h.reshape(Ho, Wo, Cout).astype(hpad_ref.dtype))

    # ---- conv2 (3x3, stride 1) + bn2 + residual add --------------------------
    # (No final ReLU: the reference module returns bn2(conv2(x)) + identity.)
    acc2 = None
    for kh in range(3):
        wins = [hpad_ref[kh:kh + Ho, kw:kw + Wo, :] for kw in range(3)]
        slab = jnp.concatenate(wins, axis=-1).reshape(M, 3 * Cout)
        d = jnp.dot(slab, w2_ref[kh], preferred_element_type=jnp.float32)
        acc2 = d if acc2 is None else acc2 + d
    out = acc2 + s2_ref[...] + identity
    out_ref[...] = out.reshape(out_ref.shape).astype(out_ref.dtype)


# ----------------------------------------------------------------------------
# Plain-JAX glue: BN folding, weight prep, parity split, pallas_call wrapper
# ----------------------------------------------------------------------------
def _fold_bn(gamma, beta, mean, var, conv_bias=None, eps=1e-5):
    scale = gamma / jnp.sqrt(var + eps)
    shift = beta - mean * scale
    if conv_bias is not None:
        shift = shift + scale * conv_bias
    return scale, shift


def _prep_conv3x3_weight(w_oihw, scale):
    # (Cout, Cin, 3, 3) -> (3, 3*Cin, Cout): per kernel row kh the three kw
    # taps are stacked along K in (kw, cin) order — matching the kernel's
    # activation-slab concat — with the BN scale folded into the Cout axis.
    cout, cin, kh, kw = w_oihw.shape
    w = jnp.transpose(w_oihw, (2, 3, 1, 0)).reshape(kh, kw * cin, cout)
    return (w * scale[None, None, :]).astype(jnp.bfloat16)


def basic_block_forward(x_nchw, params, down_sample, out_dtype=jnp.float32):
    # NOTE: pass out_dtype=jnp.bfloat16 to halve output HBM writeback when the
    # downstream block consumes bf16 anyway (default f32 preserves the PyTorch
    # module's output dtype).
    # TODO(synk): an NHWC-native entry point would drop the two wrapper
    #             transposes (one full HBM read+write pass each).
    x = jnp.transpose(x_nchw, (0, 2, 3, 1)).astype(jnp.float32)   # NCHW -> NHWC
    N, H, W, Cin = x.shape
    stride = 2 if down_sample else 1
    Cout = params["w1"].shape[0]
    assert H % stride == 0 and W % stride == 0
    Ho, Wo = H // stride, W // stride

    # Pad by 1 for the 3x3 convs and cast activations to bf16.  For stride 2,
    # split into the 4 (row, col) parity planes so in-kernel taps stay
    # unit-stride.  Total bytes == padded input (no 9x im2col expansion).
    xp = jnp.pad(x, ((0, 0), (1, 1), (1, 1), (0, 0))).astype(jnp.bfloat16)
    if down_sample:
        Hq, Wq = Ho + 1, Wo + 1
        planes = [xp[:, a::2, b::2, :] for a in (0, 1) for b in (0, 1)]
        x_in = jnp.stack(planes, axis=1)                 # (N, 4, Hq, Wq, Cin)
        x_spec = pl.BlockSpec((1, 4, Hq, Wq, Cin), lambda n: (n, 0, 0, 0, 0))
    else:
        assert Cin == Cout, "identity shortcut requires Cin == Cout"
        x_in = xp                                        # (N, H+2, W+2, Cin)
        x_spec = pl.BlockSpec((1, H + 2, W + 2, Cin), lambda n: (n, 0, 0, 0))

    s1, b1 = _fold_bn(params["bn1_g"], params["bn1_b"], params["bn1_m"],
                      params["bn1_v"], params["b1"])
    s2, b2 = _fold_bn(params["bn2_g"], params["bn2_b"], params["bn2_m"],
                      params["bn2_v"], params["b2"])
    w1 = _prep_conv3x3_weight(params["w1"], s1)          # (3, 3*Cin, Cout)
    w2 = _prep_conv3x3_weight(params["w2"], s2)          # (3, 3*Cout, Cout)

    inputs = [x_in, w1, b1.reshape(1, Cout), w2, b2.reshape(1, Cout)]
    # Weight/shift index_maps are constant -> Pallas keeps the blocks resident
    # and skips re-DMA across the (parallel) batch grid.
    in_specs = [
        x_spec,
        pl.BlockSpec((3, 3 * Cin, Cout), lambda n: (0, 0, 0)),
        pl.BlockSpec((1, Cout), lambda n: (0, 0)),
        pl.BlockSpec((3, 3 * Cout, Cout), lambda n: (0, 0, 0)),
        pl.BlockSpec((1, Cout), lambda n: (0, 0)),
    ]
    if down_sample:
        sd, bd = _fold_bn(params["bnd_g"], params["bnd_b"], params["bnd_m"],
                          params["bnd_v"], None)
        wd = (jnp.transpose(params["wd"][:, :, 0, 0], (1, 0))
              * sd[None, :]).astype(jnp.bfloat16)        # (Cin, Cout)
        inputs += [wd, bd.reshape(1, Cout)]
        in_specs += [
            pl.BlockSpec((Cin, Cout), lambda n: (0, 0)),
            pl.BlockSpec((1, Cout), lambda n: (0, 0)),
        ]

    kernel = functools.partial(_basic_block_kernel, down_sample=down_sample)
    out = pl.pallas_call(
        kernel,
        out_shape=jax.ShapeDtypeStruct((N, Ho, Wo, Cout), out_dtype),
        grid=(N,),
        in_specs=in_specs,
        out_specs=pl.BlockSpec((1, Ho, Wo, Cout), lambda n: (n, 0, 0, 0)),
        scratch_shapes=[pltpu.VMEM((Ho + 2, Wo + 2, Cout), jnp.bfloat16)],
        compiler_params=pltpu.CompilerParams(
            dimension_semantics=("parallel",)),
    )(*inputs)
    return jnp.transpose(out, (0, 3, 1, 2))              # NHWC -> NCHW


# ----------------------------------------------------------------------------
# Pure-JAX reference (lax.conv) for correctness check
# ----------------------------------------------------------------------------
def _ref_conv(x_nhwc, w_oihw, stride, pad, bias=None):
    w_hwio = jnp.transpose(w_oihw, (2, 3, 1, 0))
    y = jax.lax.conv_general_dilated(
        x_nhwc, w_hwio, (stride, stride), [(pad, pad), (pad, pad)],
        dimension_numbers=("NHWC", "HWIO", "NHWC"))
    if bias is not None:
        y = y + bias.reshape(1, 1, 1, -1)
    return y


def _ref_bn(x, g, b, m, v, eps=1e-5):
    return (x - m) / jnp.sqrt(v + eps) * g + b


def basic_block_reference(x_nchw, params, down_sample):
    x = jnp.transpose(x_nchw, (0, 2, 3, 1)).astype(jnp.float32)
    stride = 2 if down_sample else 1
    if down_sample:
        idn = _ref_conv(x, params["wd"], stride, 0)
        idn = _ref_bn(idn, params["bnd_g"], params["bnd_b"],
                      params["bnd_m"], params["bnd_v"])
    else:
        idn = x
    h = _ref_conv(x, params["w1"], stride, 1, params["b1"])
    h = jnp.maximum(_ref_bn(h, params["bn1_g"], params["bn1_b"],
                            params["bn1_m"], params["bn1_v"]), 0.0)
    h = _ref_conv(h, params["w2"], 1, 1, params["b2"])
    h = _ref_bn(h, params["bn2_g"], params["bn2_b"],
                params["bn2_m"], params["bn2_v"]) + idn
    return jnp.transpose(h, (0, 3, 1, 2))


# ----------------------------------------------------------------------------
def make_params(key, cin, cout):
    k = jax.random.split(key, 17)

    def n(i, shape, s=0.1):
        return s * jax.random.normal(k[i], shape, jnp.float32)

    return {
        "w1": n(0, (cout, cin, 3, 3)),
        "b1": n(1, (cout,)),
        "bn1_g": 1.0 + n(2, (cout,)),
        "bn1_b": n(3, (cout,)),
        "bn1_m": n(4, (cout,), 0.05),
        "bn1_v": 0.5 + jnp.abs(jax.random.normal(k[5], (cout,), jnp.float32)),
        "w2": n(6, (cout, cout, 3, 3)),
        "b2": n(7, (cout,)),
        "bn2_g": 1.0 + n(8, (cout,)),
        "bn2_b": n(9, (cout,)),
        "bn2_m": n(10, (cout,), 0.05),
        "bn2_v": 0.5 + jnp.abs(jax.random.normal(k[11], (cout,), jnp.float32)),
        "wd": n(12, (cout, cin, 1, 1)),
        "bnd_g": 1.0 + n(13, (cout,)),
        "bnd_b": n(14, (cout,)),
        "bnd_m": n(15, (cout,), 0.05),
        "bnd_v": 0.5 + jnp.abs(jax.random.normal(k[16], (cout,), jnp.float32)),
    }


if __name__ == "__main__":
    key = jax.random.PRNGKey(0)
    kx1, kx2, kp1, kp2 = jax.random.split(key, 4)

    # Case 1: down_sample=True (stride-2 conv1 + 1x1-conv/BN shortcut),
    # exercising the low-writeback bf16 output path.
    x1 = jax.random.normal(kx1, (2, 4, 16, 16), jnp.float32)
    p1 = make_params(kp1, cin=4, cout=8)
    out1 = jax.block_until_ready(
        basic_block_forward(x1, p1, down_sample=True, out_dtype=jnp.bfloat16))
    assert out1.shape == (2, 8, 8, 8), out1.shape
    ref1 = basic_block_reference(x1, p1, down_sample=True)
    out1_f = out1.astype(jnp.float32)
    err1 = float(jnp.max(jnp.abs(out1_f - ref1)))
    assert jnp.allclose(out1_f, ref1, atol=4e-2, rtol=4e-2), err1

    # Case 2: down_sample=False (identity shortcut, Cin == Cout), f32 output.
    x2 = jax.random.normal(kx2, (2, 8, 16, 16), jnp.float32)
    p2 = make_params(kp2, cin=8, cout=8)
    out2 = jax.block_until_ready(basic_block_forward(x2, p2, down_sample=False))
    assert out2.shape == (2, 8, 16, 16), out2.shape
    ref2 = basic_block_reference(x2, p2, down_sample=False)
    err2 = float(jnp.max(jnp.abs(out2 - ref2)))
    assert jnp.allclose(out2, ref2, atol=3e-2, rtol=3e-2), err2

    print("KERNEL_OK")
</pallas_src>

<mosaic_0001>
module attributes {stable_mosaic.version = 11 : i64} {
  func.func @_basic_block_kernel(%arg0: i32, %arg1: memref<1x4x9x9x4xbf16, #tpu.memory_space<vmem>>, %arg2: memref<3x12x8xbf16, #tpu.memory_space<vmem>>, %arg3: memref<1x8xf32, #tpu.memory_space<vmem>>, %arg4: memref<3x24x8xbf16, #tpu.memory_space<vmem>>, %arg5: memref<1x8xf32, #tpu.memory_space<vmem>>, %arg6: memref<4x8xbf16, #tpu.memory_space<vmem>>, %arg7: memref<1x8xf32, #tpu.memory_space<vmem>>, %arg8: memref<1x8x8x8xbf16, #tpu.memory_space<vmem>>, %arg9: memref<10x10x8xbf16, #tpu.memory_space<vmem>>) attributes {dimension_semantics = [#tpu.dimension_semantics<parallel>], iteration_bounds = array<i64: 2>, scalar_prefetch = 0 : i64, scratch_operands = 1 : i64, tpu.core_type = #tpu.core_type<tc>, window_params = [{transform_indices = @transform_0, window_bounds = array<i64: 1, 4, 9, 9, 4>}, {pipeline_mode = #tpu.pipeline_mode<synchronous>, transform_indices = @transform_1, window_bounds = array<i64: 3, 12, 8>}, {pipeline_mode = #tpu.pipeline_mode<synchronous>, transform_indices = @transform_2, window_bounds = array<i64: 1, 8>}, {pipeline_mode = #tpu.pipeline_mode<synchronous>, transform_indices = @transform_3, window_bounds = array<i64: 3, 24, 8>}, {pipeline_mode = #tpu.pipeline_mode<synchronous>, transform_indices = @transform_4, window_bounds = array<i64: 1, 8>}, {pipeline_mode = #tpu.pipeline_mode<synchronous>, transform_indices = @transform_5, window_bounds = array<i64: 4, 8>}, {pipeline_mode = #tpu.pipeline_mode<synchronous>, transform_indices = @transform_6, window_bounds = array<i64: 1, 8>}, {transform_indices = @transform_7, window_bounds = array<i64: 1, 8, 8, 8>}]} {
    %c0 = arith.constant 0 : index
    %c0_0 = arith.constant 0 : index
    %c0_1 = arith.constant 0 : index
    %c0_2 = arith.constant 0 : index
    %c0_3 = arith.constant 0 : index
    %0 = vector.load %arg1[%c0, %c0_0, %c0_1, %c0_2, %c0_3] : memref<1x4x9x9x4xbf16, #tpu.memory_space<vmem>>, vector<1x1x8x8x4xbf16>
    %1 = vector.shape_cast %0 : vector<1x1x8x8x4xbf16> to vector<8x8x4xbf16>
    %c0_4 = arith.constant 0 : index
    %c1 = arith.constant 1 : index
    %c0_5 = arith.constant 0 : index
    %c0_6 = arith.constant 0 : index
    %c0_7 = arith.constant 0 : index
    %2 = vector.load %arg1[%c0_4, %c1, %c0_5, %c0_6, %c0_7] : memref<1x4x9x9x4xbf16, #tpu.memory_space<vmem>>, vector<1x1x8x8x4xbf16>
    %3 = vector.shape_cast %2 : vector<1x1x8x8x4xbf16> to vector<8x8x4xbf16>
    %c0_8 = arith.constant 0 : index
    %c0_9 = arith.constant 0 : index
    %c0_10 = arith.constant 0 : index
    %c1_11 = arith.constant 1 : index
    %c0_12 = arith.constant 0 : index
    %4 = vector.load %arg1[%c0_8, %c0_9, %c0_10, %c1_11, %c0_12] : memref<1x4x9x9x4xbf16, #tpu.memory_space<vmem>>, vector<1x1x8x8x4xbf16>
    %5 = vector.shape_cast %4 : vector<1x1x8x8x4xbf16> to vector<8x8x4xbf16>
    %6 = tpu.concatenate %1, %3, %5 in 2 : vector<8x8x4xbf16>, vector<8x8x4xbf16>, vector<8x8x4xbf16> -> vector<8x8x12xbf16>
    %7 = vector.shape_cast %6 : vector<8x8x12xbf16> to vector<64x12xbf16>
    %c0_13 = arith.constant 0 : index
    %c0_14 = arith.constant 0 : index
    %c0_15 = arith.constant 0 : index
    %8 = vector.load %arg2[%c0_13, %c0_14, %c0_15] : memref<3x12x8xbf16, #tpu.memory_space<vmem>>, vector<1x12x8xbf16>
    %9 = vector.shape_cast %8 : vector<1x12x8xbf16> to vector<12x8xbf16>
    %cst = arith.constant dense<0.000000e+00> : vector<64x8xf32>
    %10 = tpu.matmul %7, %9, %cst {dimension_numbers = #tpu.dot_dimension_numbers<[1], [0], [0], [1], [0, 0, 1, 1], [], []>} : vector<64x12xbf16>, vector<12x8xbf16>, vector<64x8xf32> -> vector<64x8xf32>
    %c0_16 = arith.constant 0 : index
    %c2 = arith.constant 2 : index
    %c0_17 = arith.constant 0 : index
    %c0_18 = arith.constant 0 : index
    %c0_19 = arith.constant 0 : index
    %11 = vector.load %arg1[%c0_16, %c2, %c0_17, %c0_18, %c0_19] : memref<1x4x9x9x4xbf16, #tpu.memory_space<vmem>>, vector<1x1x8x8x4xbf16>
    %12 = vector.shape_cast %11 : vector<1x1x8x8x4xbf16> to vector<8x8x4xbf16>
    %c0_20 = arith.constant 0 : index
    %c3 = arith.constant 3 : index
    %c0_21 = arith.constant 0 : index
    %c0_22 = arith.constant 0 : index
    %c0_23 = arith.constant 0 : index
    %13 = vector.load %arg1[%c0_20, %c3, %c0_21, %c0_22, %c0_23] : memref<1x4x9x9x4xbf16, #tpu.memory_space<vmem>>, vector<1x1x8x8x4xbf16>
    %14 = vector.shape_cast %13 : vector<1x1x8x8x4xbf16> to vector<8x8x4xbf16>
    %c0_24 = arith.constant 0 : index
    %c2_25 = arith.constant 2 : index
    %c0_26 = arith.constant 0 : index
    %c1_27 = arith.constant 1 : index
    %c0_28 = arith.constant 0 : index
    %15 = vector.load %arg1[%c0_24, %c2_25, %c0_26, %c1_27, %c0_28] : memref<1x4x9x9x4xbf16, #tpu.memory_space<vmem>>, vector<1x1x8x8x4xbf16>
    %16 = vector.shape_cast %15 : vector<1x1x8x8x4xbf16> to vector<8x8x4xbf16>
    %17 = tpu.concatenate %12, %14, %16 in 2 : vector<8x8x4xbf16>, vector<8x8x4xbf16>, vector<8x8x4xbf16> -> vector<8x8x12xbf16>
    %18 = vector.shape_cast %17 : vector<8x8x12xbf16> to vector<64x12xbf16>
    %c1_29 = arith.constant 1 : index
    %c0_30 = arith.constant 0 : index
    %c0_31 = arith.constant 0 : index
    %19 = vector.load %arg2[%c1_29, %c0_30, %c0_31] : memref<3x12x8xbf16, #tpu.memory_space<vmem>>, vector<1x12x8xbf16>
    %20 = vector.shape_cast %19 : vector<1x12x8xbf16> to vector<12x8xbf16>
    %cst_32 = arith.constant dense<0.000000e+00> : vector<64x8xf32>
    %21 = tpu.matmul %18, %20, %cst_32 {dimension_numbers = #tpu.dot_dimension_numbers<[1], [0], [0], [1], [0, 0, 1, 1], [], []>} : vector<64x12xbf16>, vector<12x8xbf16>, vector<64x8xf32> -> vector<64x8xf32>
    %22 = arith.addf %10, %21 : vector<64x8xf32>
    %23 = vector.shape_cast %14 : vector<8x8x4xbf16> to vector<64x4xbf16>
    %c0_33 = arith.constant 0 : index
    %c0_34 = arith.constant 0 : index
    %24 = vector.load %arg6[%c0_33, %c0_34] : memref<4x8xbf16, #tpu.memory_space<vmem>>, vector<4x8xbf16>
    %cst_35 = arith.constant dense<0.000000e+00> : vector<64x8xf32>
    %25 = tpu.matmul %23, %24, %cst_35 {dimension_numbers = #tpu.dot_dimension_numbers<[1], [0], [0], [1], [0, 0, 1, 1], [], []>} : vector<64x4xbf16>, vector<4x8xbf16>, vector<64x8xf32> -> vector<64x8xf32>
    %c0_36 = arith.constant 0 : index
    %c0_37 = arith.constant 0 : index
    %26 = vector.load %arg7[%c0_36, %c0_37] : memref<1x8xf32, #tpu.memory_space<vmem>>, vector<1x8xf32>
    %27 = vector.broadcast %26 : vector<1x8xf32> to vector<64x8xf32>
    %28 = arith.addf %25, %27 : vector<64x8xf32>
    %c0_38 = arith.constant 0 : index
    %c0_39 = arith.constant 0 : index
    %c1_40 = arith.constant 1 : index
    %c0_41 = arith.constant 0 : index
    %c0_42 = arith.constant 0 : index
    %29 = vector.load %arg1[%c0_38, %c0_39, %c1_40, %c0_41, %c0_42] : memref<1x4x9x9x4xbf16, #tpu.memory_space<vmem>>, vector<1x1x8x8x4xbf16>
    %30 = vector.shape_cast %29 : vector<1x1x8x8x4xbf16> to vector<8x8x4xbf16>
    %c0_43 = arith.constant 0 : index
    %c1_44 = arith.constant 1 : index
    %c1_45 = arith.constant 1 : index
    %c0_46 = arith.constant 0 : index
    %c0_47 = arith.constant 0 : index
    %31 = vector.load %arg1[%c0_43, %c1_44, %c1_45, %c0_46, %c0_47] : memref<1x4x9x9x4xbf16, #tpu.memory_space<vmem>>, vector<1x1x8x8x4xbf16>
    %32 = vector.shape_cast %31 : vector<1x1x8x8x4xbf16> to vector<8x8x4xbf16>
    %c0_48 = arith.constant 0 : index
    %c0_49 = arith.constant 0 : index
    %c1_50 = arith.constant 1 : index
    %c1_51 = arith.constant 1 : index
    %c0_52 = arith.constant 0 : index
    %33 = vector.load %arg1[%c0_48, %c0_49, %c1_50, %c1_51, %c0_52] : memref<1x4x9x9x4xbf16, #tpu.memory_space<vmem>>, vector<1x1x8x8x4xbf16>
    %34 = vector.shape_cast %33 : vector<1x1x8x8x4xbf16> to vector<8x8x4xbf16>
    %35 = tpu.concatenate %30, %32, %34 in 2 : vector<8x8x4xbf16>, vector<8x8x4xbf16>, vector<8x8x4xbf16> -> vector<8x8x12xbf16>
    %36 = vector.shape_cast %35 : vector<8x8x12xbf16> to vector<64x12xbf16>
    %c2_53 = arith.constant 2 : index
    %c0_54 = arith.constant 0 : index
    %c0_55 = arith.constant 0 : index
    %37 = vector.load %arg2[%c2_53, %c0_54, %c0_55] : memref<3x12x8xbf16, #tpu.memory_space<vmem>>, vector<1x12x8xbf16>
    %38 = vector.shape_cast %37 : vector<1x12x8xbf16> to vector<12x8xbf16>
    %cst_56 = arith.constant dense<0.000000e+00> : vector<64x8xf32>
    %39 = tpu.matmul %36, %38, %cst_56 {dimension_numbers = #tpu.dot_dimension_numbers<[1], [0], [0], [1], [0, 0, 1, 1], [], []>} : vector<64x12xbf16>, vector<12x8xbf16>, vector<64x8xf32> -> vector<64x8xf32>
    %40 = arith.addf %22, %39 : vector<64x8xf32>
    %c0_57 = arith.constant 0 : index
    %c0_58 = arith.constant 0 : index
    %41 = vector.load %arg3[%c0_57, %c0_58] : memref<1x8xf32, #tpu.memory_space<vmem>>, vector<1x8xf32>
    %42 = vector.broadcast %41 : vector<1x8xf32> to vector<64x8xf32>
    %43 = arith.addf %40, %42 : vector<64x8xf32>
    %cst_59 = arith.constant 0.000000e+00 : f32
    %44 = vector.broadcast %cst_59 : f32 to vector<64x8xf32>
    %45 = arith.maximumf %43, %44 : vector<64x8xf32>
    %cst_60 = arith.constant 0.000000e+00 : bf16
    %46 = vector.broadcast %cst_60 : bf16 to vector<1x10x8xbf16>
    %cst_61 = arith.constant 0.000000e+00 : bf16
    %47 = vector.broadcast %cst_61 : bf16 to vector<8x1x8xbf16>
    %c0_62 = arith.constant 0 : index
    %c0_63 = arith.constant 0 : index
    %c0_64 = arith.constant 0 : index
    %48 = vector.load %arg9[%c0_62, %c0_63, %c0_64] : memref<10x10x8xbf16, #tpu.memory_space<vmem>>, vector<1x10x8xbf16>
    tpu.vector_store %arg9[%c0_62, %c0_63, %c0_64], %46 {strides = array<i32>} : memref<10x10x8xbf16, #tpu.memory_space<vmem>>, vector<1x10x8xbf16>,
    %c9 = arith.constant 9 : index
    %c0_65 = arith.constant 0 : index
    %c0_66 = arith.constant 0 : index
    %49 = vector.load %arg9[%c9, %c0_65, %c0_66] : memref<10x10x8xbf16, #tpu.memory_space<vmem>>, vector<1x10x8xbf16>
    tpu.vector_store %arg9[%c9, %c0_65, %c0_66], %46 {strides = array<i32>} : memref<10x10x8xbf16, #tpu.memory_space<vmem>>, vector<1x10x8xbf16>,
    %c1_67 = arith.constant 1 : index
    %c0_68 = arith.constant 0 : index
    %c0_69 = arith.constant 0 : index
    %50 = vector.load %arg9[%c1_67, %c0_68, %c0_69] : memref<10x10x8xbf16, #tpu.memory_space<vmem>>, vector<8x1x8xbf16>
    tpu.vector_store %arg9[%c1_67, %c0_68, %c0_69], %47 {strides = array<i32>} : memref<10x10x8xbf16, #tpu.memory_space<vmem>>, vector<8x1x8xbf16>,
    %c1_70 = arith.constant 1 : index
    %c9_71 = arith.constant 9 : index
    %c0_72 = arith.constant 0 : index
    %51 = vector.load %arg9[%c1_70, %c9_71, %c0_72] : memref<10x10x8xbf16, #tpu.memory_space<vmem>>, vector<8x1x8xbf16>
    tpu.vector_store %arg9[%c1_70, %c9_71, %c0_72], %47 {strides = array<i32>} : memref<10x10x8xbf16, #tpu.memory_space<vmem>>, vector<8x1x8xbf16>,
    %52 = vector.shape_cast %45 : vector<64x8xf32> to vector<8x8x8xf32>
    %53 = arith.truncf %52 : vector<8x8x8xf32> to vector<8x8x8xbf16>
    %c1_73 = arith.constant 1 : index
    %c1_74 = arith.constant 1 : index
    %c0_75 = arith.constant 0 : index
    %54 = vector.load %arg9[%c1_73, %c1_74, %c0_75] : memref<10x10x8xbf16, #tpu.memory_space<vmem>>, vector<8x8x8xbf16>
    tpu.vector_store %arg9[%c1_73, %c1_74, %c0_75], %53 {strides = array<i32>} : memref<10x10x8xbf16, #tpu.memory_space<vmem>>, vector<8x8x8xbf16>,
    %c0_76 = arith.constant 0 : index
    %c0_77 = arith.constant 0 : index
    %c0_78 = arith.constant 0 : index
    %55 = vector.load %arg9[%c0_76, %c0_77, %c0_78] : memref<10x10x8xbf16, #tpu.memory_space<vmem>>, vector<8x8x8xbf16>
    %c0_79 = arith.constant 0 : index
    %c1_80 = arith.constant 1 : index
    %c0_81 = arith.constant 0 : index
    %56 = vector.load %arg9[%c0_79, %c1_80, %c0_81] : memref<10x10x8xbf16, #tpu.memory_space<vmem>>, vector<8x8x8xbf16>
    %c0_82 = arith.constant 0 : index
    %c2_83 = arith.constant 2 : index
    %c0_84 = arith.constant 0 : index
    %57 = vector.load %arg9[%c0_82, %c2_83, %c0_84] : memref<10x10x8xbf16, #tpu.memory_space<vmem>>, vector<8x8x8xbf16>
    %58 = tpu.concatenate %55, %56, %57 in 2 : vector<8x8x8xbf16>, vector<8x8x8xbf16>, vector<8x8x8xbf16> -> vector<8x8x24xbf16>
    %59 = vector.shape_cast %58 : vector<8x8x24xbf16> to vector<64x24xbf16>
    %c0_85 = arith.constant 0 : index
    %c0_86 = arith.constant 0 : index
    %c0_87 = arith.constant 0 : index
    %60 = vector.load %arg4[%c0_85, %c0_86, %c0_87] : memref<3x24x8xbf16, #tpu.memory_space<vmem>>, vector<1x24x8xbf16>
    %61 = vector.shape_cast %60 : vector<1x24x8xbf16> to vector<24x8xbf16>
    %cst_88 = arith.constant dense<0.000000e+00> : vector<64x8xf32>
    %62 = tpu.matmul %59, %61, %cst_88 {dimension_numbers = #tpu.dot_dimension_numbers<[1], [0], [0], [1], [0, 0, 1, 1], [], []>} : vector<64x24xbf16>, vector<24x8xbf16>, vector<64x8xf32> -> vector<64x8xf32>
    %c1_89 = arith.constant 1 : index
    %c0_90 = arith.constant 0 : index
    %c0_91 = arith.constant 0 : index
    %63 = vector.load %arg9[%c1_89, %c0_90, %c0_91] : memref<10x10x8xbf16, #tpu.memory_space<vmem>>, vector<8x8x8xbf16>
    %c1_92 = arith.constant 1 : index
    %c1_93 = arith.constant 1 : index
    %c0_94 = arith.constant 0 : index
    %64 = vector.load %arg9[%c1_92, %c1_93, %c0_94] : memref<10x10x8xbf16, #tpu.memory_space<vmem>>, vector<8x8x8xbf16>
    %c1_95 = arith.constant 1 : index
    %c2_96 = arith.constant 2 : index
    %c0_97 = arith.constant 0 : index
    %65 = vector.load %arg9[%c1_95, %c2_96, %c0_97] : memref<10x10x8xbf16, #tpu.memory_space<vmem>>, vector<8x8x8xbf16>
    %66 = tpu.concatenate %63, %64, %65 in 2 : vector<8x8x8xbf16>, vector<8x8x8xbf16>, vector<8x8x8xbf16> -> vector<8x8x24xbf16>
    %67 = vector.shape_cast %66 : vector<8x8x24xbf16> to vector<64x24xbf16>
    %c1_98 = arith.constant 1 : index
    %c0_99 = arith.constant 0 : index
    %c0_100 = arith.constant 0 : index
    %68 = vector.load %arg4[%c1_98, %c0_99, %c0_100] : memref<3x24x8xbf16, #tpu.memory_space<vmem>>, vector<1x24x8xbf16>
    %69 = vector.shape_cast %68 : vector<1x24x8xbf16> to vector<24x8xbf16>
    %cst_101 = arith.constant dense<0.000000e+00> : vector<64x8xf32>
    %70 = tpu.matmul %67, %69, %cst_101 {dimension_numbers = #tpu.dot_dimension_numbers<[1], [0], [0], [1], [0, 0, 1, 1], [], []>} : vector<64x24xbf16>, vector<24x8xbf16>, vector<64x8xf32> -> vector<64x8xf32>
    %71 = arith.addf %62, %70 : vector<64x8xf32>
    %c2_102 = arith.constant 2 : index
    %c0_103 = arith.constant 0 : index
    %c0_104 = arith.constant 0 : index
    %72 = vector.load %arg9[%c2_102, %c0_103, %c0_104] : memref<10x10x8xbf16, #tpu.memory_space<vmem>>, vector<8x8x8xbf16>
    %c2_105 = arith.constant 2 : index
    %c1_106 = arith.constant 1 : index
    %c0_107 = arith.constant 0 : index
    %73 = vector.load %arg9[%c2_105, %c1_106, %c0_107] : memref<10x10x8xbf16, #tpu.memory_space<vmem>>, vector<8x8x8xbf16>
    %c2_108 = arith.constant 2 : index
    %c2_109 = arith.constant 2 : index
    %c0_110 = arith.constant 0 : index
    %74 = vector.load %arg9[%c2_108, %c2_109, %c0_110] : memref<10x10x8xbf16, #tpu.memory_space<vmem>>, vector<8x8x8xbf16>
    %75 = tpu.concatenate %72, %73, %74 in 2 : vector<8x8x8xbf16>, vector<8x8x8xbf16>, vector<8x8x8xbf16> -> vector<8x8x24xbf16>
    %76 = vector.shape_cast %75 : vector<8x8x24xbf16> to vector<64x24xbf16>
    %c2_111 = arith.constant 2 : index
    %c0_112 = arith.constant 0 : index
    %c0_113 = arith.constant 0 : index
    %77 = vector.load %arg4[%c2_111, %c0_112, %c0_113] : memref<3x24x8xbf16, #tpu.memory_space<vmem>>, vector<1x24x8xbf16>
    %78 = vector.shape_cast %77 : vector<1x24x8xbf16> to vector<24x8xbf16>
    %cst_114 = arith.constant dense<0.000000e+00> : vector<64x8xf32>
    %79 = tpu.matmul %76, %78, %cst_114 {dimension_numbers = #tpu.dot_dimension_numbers<[1], [0], [0], [1], [0, 0, 1, 1], [], []>} : vector<64x24xbf16>, vector<24x8xbf16>, vector<64x8xf32> -> vector<64x8xf32>
    %80 = arith.addf %71, %79 : vector<64x8xf32>
    %c0_115 = arith.constant 0 : index
    %c0_116 = arith.constant 0 : index
    %81 = vector.load %arg5[%c0_115, %c0_116] : memref<1x8xf32, #tpu.memory_space<vmem>>, vector<1x8xf32>
    %82 = vector.broadcast %81 : vector<1x8xf32> to vector<64x8xf32>
    %83 = arith.addf %80, %82 : vector<64x8xf32>
    %84 = arith.addf %83, %28 : vector<64x8xf32>
    %85 = vector.shape_cast %84 : vector<64x8xf32> to vector<1x8x8x8xf32>
    %86 = arith.truncf %85 : vector<1x8x8x8xf32> to vector<1x8x8x8xbf16>
    %c0_117 = arith.constant 0 : index
    %c0_118 = arith.constant 0 : index
    %c0_119 = arith.constant 0 : index
    %c0_120 = arith.constant 0 : index
    %87 = vector.load %arg8[%c0_117, %c0_118, %c0_119, %c0_120] : memref<1x8x8x8xbf16, #tpu.memory_space<vmem>>, vector<1x8x8x8xbf16>
    tpu.vector_store %arg8[%c0_117, %c0_118, %c0_119, %c0_120], %86 {strides = array<i32>} : memref<1x8x8x8xbf16, #tpu.memory_space<vmem>>, vector<1x8x8x8xbf16>,
    return
  }
  func.func @transform_0(%arg0: i32) -> (i32, i32, i32, i32, i32) {
    %c0_i32 = arith.constant 0 : i32
    %c0_i32_0 = arith.constant 0 : i32
    %c0_i32_1 = arith.constant 0 : i32
    %c0_i32_2 = arith.constant 0 : i32
    %c0_i32_3 = arith.constant 0 : i32
    return %arg0, %c0_i32, %c0_i32_0, %c0_i32_1, %c0_i32_2 : i32, i32, i32, i32, i32
  }
  func.func @transform_1(%arg0: i32) -> (i32, i32, i32) {
    %c0_i32 = arith.constant 0 : i32
    %c0_i32_0 = arith.constant 0 : i32
    %c0_i32_1 = arith.constant 0 : i32
    %c0_i32_2 = arith.constant 0 : i32
    return %c0_i32, %c0_i32_0, %c0_i32_1 : i32, i32, i32
  }
  func.func @transform_2(%arg0: i32) -> (i32, i32) {
    %c0_i32 = arith.constant 0 : i32
    %c0_i32_0 = arith.constant 0 : i32
    %c0_i32_1 = arith.constant 0 : i32
    return %c0_i32, %c0_i32_0 : i32, i32
  }
  func.func @transform_3(%arg0: i32) -> (i32, i32, i32) {
    %c0_i32 = arith.constant 0 : i32
    %c0_i32_0 = arith.constant 0 : i32
    %c0_i32_1 = arith.constant 0 : i32
    %c0_i32_2 = arith.constant 0 : i32
    return %c0_i32, %c0_i32_0, %c0_i32_1 : i32, i32, i32
  }
  func.func @transform_4(%arg0: i32) -> (i32, i32) {
    %c0_i32 = arith.constant 0 : i32
    %c0_i32_0 = arith.constant 0 : i32
    %c0_i32_1 = arith.constant 0 : i32
    return %c0_i32, %c0_i32_0 : i32, i32
  }
  func.func @transform_5(%arg0: i32) -> (i32, i32) {
    %c0_i32 = arith.constant 0 : i32
    %c0_i32_0 = arith.constant 0 : i32
    %c0_i32_1 = arith.constant 0 : i32
    return %c0_i32, %c0_i32_0 : i32, i32
  }
  func.func @transform_6(%arg0: i32) -> (i32, i32) {
    %c0_i32 = arith.constant 0 : i32
    %c0_i32_0 = arith.constant 0 : i32
    %c0_i32_1 = arith.constant 0 : i32
    return %c0_i32, %c0_i32_0 : i32, i32
  }
  func.func @transform_7(%arg0: i32) -> (i32, i32, i32, i32) {
    %c0_i32 = arith.constant 0 : i32
    %c0_i32_0 = arith.constant 0 : i32
    %c0_i32_1 = arith.constant 0 : i32
    %c0_i32_2 = arith.constant 0 : i32
    return %arg0, %c0_i32, %c0_i32_0, %c0_i32_1 : i32, i32, i32, i32
  }
}

</mosaic_0001>

<bundles_post_ra>
// kernel: tpu_custom_call.1
= control target key start
LH: loop header
LB: loop body
LE: loop exit
PB: predicated region body
PF: predicated region fallthrough
CT: control target
= control target key end

     0   :  { %12 = vsyncpa [#allocation4], 0  ;;  %s4323_s0 = inlined_call_operand.vmem [shape: bf16[2,4,9,9,4], index: 0, kind: input, shape index: {}]   ;;  %s4324_s1 = inlined_call_operand.vmem [shape: bf16[3,12,8], index: 1, kind: input, shape index: {}]   ;;  %s4325_s2 = inlined_call_operand.vmem [shape: f32[1,8], index: 2, kind: input, shape index: {}]   ;;  %s4326_s3 = inlined_call_operand.vmem [shape: bf16[3,24,8], index: 3, kind: input, shape index: {}]   ;;  %s4327_s4 = inlined_call_operand.vmem [shape: f32[1,8], index: 4, kind: input, shape index: {}]   ;;  %s4328_s5 = inlined_call_operand.vmem [shape: bf16[4,8], index: 5, kind: input, shape index: {}]   ;;  %s4329_s6 = inlined_call_operand.vmem [shape: f32[1,8], index: 6, kind: input, shape index: {}]   ;;  %s4330_s7 = inlined_call_operand.hbm [shape: bf16[2,8,8,8], index: 7, kind: output, shape index: {}]  }
   0x1   :  { %14 = vsyncpa [#allocation4 + $0x1], 0  ;;  %s3445_s24 = smov 0   ;;  %s3447_s25 = smov 0  }
   0x2   :  { %s3449_s26 = smov 0   ;;  %s3451_s27 = smov 0  }
   0x3 LB: > { %s3466_s28 = sadd.s32 4294967295, %s3397_s27   ;;  %s2742_s29 = sadd.s32 4294967294, %s3397_s27   ;;  %s3397_s27 = sphi %s3451_s27, %s4342_s27   ;;  %s3393_s26 = sphi %s3449_s26, %s4341_s26   ;;  %s3389_s25 = sphi %s3447_s25, %s4340_s25   ;;  %s3385_s24 = sphi %s3445_s24, %s4339_s24  }
   0x4   : > { %s3470_s30 = sadd.s32 1, %s3397_s27   ;;  %s179_s8 = sadd.s32 1, %s3393_s26 }
   0x5   : > { %s176_s9 = ssub.s32 %s3397_s27, %s3470_s30  ;;  %p189_p0 = scmp.ne.s32.totalorder %s3393_s26, %s3389_s25 }
   0x6   : > { %p177_p1 = scmp.eq.s32.totalorder %s176_s9, 0  ;;  %p190_p2 = scmp.eq.s32.totalorder %s3466_s28, 1 }
   0x7   : > { %p195_p3 = scmp.ne.s32.totalorder %s3389_s25, %s3385_s24  ;;  %p196_p4 = scmp.eq.s32.totalorder %s2742_s29, 1 }
   0x8   : > { %s3481_s10 = scalar_select %p177_p1, %s3393_s26, %s179_s8  }
   0x9   : > { %p3483_p5 = por %p190_p2, %p189_p0  ;;  %p3487_p6 = por %p196_p4, %p195_p3 }
   0xa   : > { %p2745_p7 = scmp.ge.s32.totalorder %s3397_s27, 1  ;;  %p240_p8 = scmp.lt.s32.totalorder %s3397_s27, 3 }
   0xc   : > { %p241_p9 = pnand %p2745_p7, %p240_p8 }
   0xd   : > { %p272_p10 = scmp.lt.s32.totalorder (!%p241_p9), %s3466_s28, 1  ;;  %s3399_s18 = smov (!%p241_p9), 4   ;;  %vm758_vm0 = vcmask (!%p241_p9), 1045504   ;;  %vm956_vm1 = vcmask (!%p241_p9), 1041408   ;;  %vm455_vm2 = vcmask (!%p241_p9), 31744   ;;  %vm480_vm3 = vcmask (!%p241_p9), 64512  }
   0xe   : > { %244 = sbr.rel (%p241_p9) target bundleno = 912 (0x390), region = 48  ;;  %s3400_s19 = smov (!%p241_p9), 8   ;;  %vm745_vm4 = vcmask (!%p241_p9), 97280   ;;  %vm1382_vm5 = vcmask (!%p241_p9), 60416   ;;  %vm1384_vm6 = vcmask (!%p241_p9), 57344   ;;  %vm2103_vm12 = vcmask (!%p241_p9), 1043456  }
   0xf   : > { %vm1391_vm7 = vsmask.f32 (!%p241_p9), 256  ;;  %vm1417_vm8 = vsmask.f32 (!%p241_p9), 7938  ;;  %vm1813_vm13 = vcmask (!%p241_p9), 130048   ;;  %vm2090_vm14 = vcmask (!%p241_p9), 195584  }
  0x10   : > { %vm3850_vm9 = vmand (!%p241_p9), %vm1384_vm6, %vm1391_vm7  ;;  %s269_s21 = sand.u32 (!%p241_p9), 1, %s3389_s25   ;;  %s3403_s16 = smov (!%p241_p9), [#allocation3]  }
  0x11   : > { %vm3857_vm10 = vmand (!%p241_p9), %vm1384_vm6, %vm1417_vm8  ;;  %s3339_s20 = sshll.u32 (!%p241_p9), %s3403_s16, 4  ;;  %s3340_s20 = int_to_ptr.vmem [resolvable:$false] %s3339_s20 }
  0x12   : > { %vm3915_vm11 = vmand (!%p241_p9), %vm1382_vm5, %vm1417_vm8  ;;  %s3341_s22 = scalar_lea.vmem (!%p241_p9), %s3340_s20, 1024 }
  0x15   : > { %s273_s13 = scalar_select %p272_p10, %s3466_s28, 1 }
  0x17   : > { %s3180_s14 = smul.u32 288, %s273_s13 }
  0x19   : > { %s3498_s17 = scalar_lea.vmem %s4323_s0, %s3180_s14  ;;  %s3402_s14 = smov 16  }
  0x1a   : > { %v3501_v0 = vld [vmem:[%s3498_s17 + $0xe8] sm:$0xf]  ;;  %v3504_v1 = vld [vmem:[%s3498_s17 + $0xf0] sm:$0xf]  ;;  %v3507_v2 = vld [vmem:[%s3498_s17 + $0xd8] sm:$0xf] }
  0x1b   : > { %v2798_v3 = vcombine.low %v3501_v0, %v3501_v0  ;;  %v2834_v4 = vcombine.low %v3501_v0, %v3504_v1  ;;  %v3514_v5 = vld [vmem:[%s3498_s17 + $0xe0] sm:$0xf]  ;;  %v2796_v6 = vcombine.low %v3507_v2, %v3507_v2  ;;  %v2784_v9 = vld [vmem:[%s3498_s17 + $0xf8] sm:$0xf]  ;;  %v2789_v11 = vld [vmem:[%s3498_s17 + $0x9c] sm:$0x1]  ;;  %v2799_v13 = vcombine.low %v3504_v1, %v3504_v1 }
  0x1c   : > { %v2833_v7 = vcombine.low %v3507_v2, %v3514_v5  ;;  %v2785_v8 = vld [vmem:[%s3498_s17 + $0x100] sm:$0xf]  ;;  %v3523_v10 = vld [vmem:[%s3498_s17 + $0x98] sm:$0xf]  ;;  %v3527_v12 = vld [vmem:[%s3498_s17 + $0x90] sm:$0xf]  ;;  %v2797_v14 = vcombine.low %v3514_v5, %v3514_v5  ;;  %v2800_v31 = vcombine.low %v2784_v9, %v2784_v9 }
  0x1d   : > { %553 = vrot.lane.b32.xlu1 %v2798_v3, %s3399_s18  ;;  %549 = vrot.lane.b32.xlu0 %v2796_v6, %s3399_s18  ;;  %v2805_v15 = vcombine.low %v3523_v10, %v2789_v11  ;;  %v2788_v16 = vld [vmem:[%s3498_s17 + $0x94] sm:$0x1]  ;;  %v3538_v17 = vld [vmem:[%s3498_s17 + $0xa8] sm:$0xf]  ;;  %v2801_v30 = vcombine.low %v2785_v8, %v2785_v8 }
  0x1e   : > { %v2804_v18 = vcombine.low %v3527_v12, %v2788_v16  ;;  %v2791_v19 = vld [vmem:[%s3498_s17 + $0xac] sm:$0x1]  ;;  %v3543_v20 = vld [vmem:[%s3498_s17 + $0xa0] sm:$0xf]  ;;  %v2790_v21 = vld [vmem:[%s3498_s17 + $0xa4] sm:$0x1] }
  0x1f   : > { %v613_v22 = vshrl.u32 %v2805_v15, 16  ;;  %v615_v23 = vshll.u32 %v2805_v15, 16  ;;  %v2807_v24 = vcombine.low %v3538_v17, %v2791_v19  ;;  %v2806_v25 = vcombine.low %v3543_v20, %v2790_v21  ;;  %v3549_v28 = vld [vmem:[%s3498_s17 + $0x110] sm:$0xf]  ;;  %v3552_v29 = vld [vmem:[%s3498_s17 + $0x108] sm:$0xf] }
  0x20   : > { %v606_v26 = vshrl.u32 %v2804_v18, 16  ;;  %v608_v27 = vshll.u32 %v2804_v18, 16  ;;  %v3557_v34 = vld [vmem:[%s3498_s17 + $0xb8] sm:$0xf]  ;;  %v2793_v35 = vld [vmem:[%s3498_s17 + $0xbc] sm:$0x1]  ;;  %v2836_v38 = vcombine.low %v3552_v29, %v3549_v28  ;;  %v2803_v59 = vcombine.low %v3549_v28, %v3549_v28 }
  0x21   : > { %555 = vrot.lane.b32.xlu1 %v2799_v13, %s3399_s18  ;;  %551 = vrot.lane.b32.xlu0 %v2797_v14, %s3399_s18  ;;  %v617_v32 = vrot.slane %v615_v23, 1  ;;  %v629_v33 = vshll.u32 %v2807_v24, 16  ;;  %v622_v37 = vshll.u32 %v2806_v25, 16  ;;  %v3563_v39 = vld [vmem:[%s3498_s17 + $0xb0] sm:$0xf]  ;;  %v627_v42 = vshrl.u32 %v2807_v24, 16 }
  0x22   : > { %v610_v36 = vrot.slane %v608_v27, 1  ;;  %v2792_v40 = vld [vmem:[%s3498_s17 + $0xb4] sm:$0x1]  ;;  %v620_v43 = vshrl.u32 %v2806_v25, 16  ;;  %v2809_v44 = vcombine.low %v3557_v34, %v2793_v35  ;;  %v3568_v45 = vld [vmem:[%s3498_s17 + $0xc8] sm:$0xf]  ;;  %v2802_v60 = vcombine.low %v3552_v29, %v3552_v29 }
  0x23   : > { %v618_v41 = vor.u32 %v617_v32, %v613_v22  ;;  %v631_v47 = vrot.slane %v629_v33, 1  ;;  %v624_v48 = vrot.slane %v622_v37, 1  ;;  %v2808_v49 = vcombine.low %v3563_v39, %v2792_v40  ;;  %v2795_v50 = vld [vmem:[%s3498_s17 + $0xcc] sm:$0x1]  ;;  %v3575_v51 = vld [vmem:[%s3498_s17 + $0xc0] sm:$0xf] }
  0x24   : > { %v611_v46 = vor.u32 %v610_v36, %v606_v26  ;;  %v2794_v52 = vld [vmem:[%s3498_s17 + $0xc4] sm:$0x1]  ;;  %v643_v53 = vshll.u32 %v2809_v44, 16  ;;  %v2811_v54 = vcombine.low %v3568_v45, %v2795_v50  ;;  %v641_v61 = vshrl.u32 %v2809_v44, 16  ;;  %v3591_v18 = vld [vmem:[%s3498_s17 + $0x8] sm:$0xf] }
  0x25   : > { %559 = vrot.lane.b32.xlu1 %v2801_v30, %s3399_s18  ;;  %557 = vrot.lane.b32.xlu0 %v2800_v31, %s3399_s18  ;;  %v632_v55 = vor.u32 %v631_v47, %v627_v42  ;;  %v625_v56 = vor.u32 %v624_v48, %v620_v43  ;;  %v636_v57 = vshll.u32 %v2808_v49, 16  ;;  %v2810_v58 = vcombine.low %v3575_v51, %v2794_v52  ;;  %v296_v19 = vld [vmem:[%s3498_s17 + $0xc] sm:$0x1]  ;;  %v3595_v21 = vld [vmem:[%s3498_s17] sm:$0xf] }
  0x26   : > { %v657_v62 = vshll.u32 %v2811_v54, 16  ;;  %v645_v63 = vrot.slane %v643_v53, 1  ;;  %v634_v3 = vshrl.u32 %v2808_v49, 16  ;;  %v655_v9 = vshrl.u32 %v2811_v54, 16  ;;  %v295_v22 = vld [vmem:[%s3498_s17 + $0x4] sm:$0x1] }
  0x27   : > { %v638_v6 = vrot.slane %v636_v57, 1  ;;  %v650_v8 = vshll.u32 %v2810_v58, 16  ;;  %v648_v15 = vshrl.u32 %v2810_v58, 16  ;;  %v3599_v24 = vld [vmem:[%s3498_s17 + $0x18] sm:$0xf]  ;;  %v2765_v26 = vcombine.low %v3591_v18, %v296_v19  ;;  %v4067_v29 = vld [vmem:[%s4326_s3] sm:$0xff]  }
  0x28   : > { %v659_v11 = vrot.slane %v657_v62, 1  ;;  %v646_v13 = vor.u32 %v645_v63, %v641_v61  ;;  %v2764_v27 = vcombine.low %v3595_v21, %v295_v22  ;;  %v298_v30 = vld [vmem:[%s3498_s17 + $0x1c] sm:$0x1]  ;;  %v3607_v31 = vld [vmem:[%s3498_s17 + $0x10] sm:$0xf] }
  0x29   : > { %663 = vrot.lane.b32.xlu1 %v618_v41, %s3400_s19  ;;  %661 = vrot.lane.b32.xlu0 %v611_v46, %s3400_s19  ;;  %v639_v14 = vor.u32 %v638_v6, %v634_v3  ;;  %v652_v16 = vrot.slane %v650_v8, 1  ;;  %v297_v32 = vld [vmem:[%s3498_s17 + $0x14] sm:$0x1]  ;;  %v2767_v33 = vcombine.low %v3599_v24, %v298_v30  ;;  %v3244_v35 = vld [vmem:[%s3498_s17 + $0x50] ss:$0 sps:$4 sm:$0xff]   ;;  %v393_v37 = vshll.u32 %v2765_v26, 16 }
  0x2a   : > { %v660_v23 = vor.u32 %v659_v11, %v655_v9  ;;  %v3245_v36 = vld [vmem:[%s3498_s17 + $0x48] ss:$0 sps:$4 sm:$0xff]   ;;  %v386_v40 = vshll.u32 %v2764_v27, 16  ;;  %v2766_v41 = vcombine.low %v3607_v31, %v297_v32  ;;  %v3246_v42 = vld [vmem:[%s3498_s17 + $0x60] ss:$0 sps:$4 sm:$0xff]   ;;  %v391_v44 = vshrl.u32 %v2765_v26, 16 }
  0x2b   : > { %v653_v25 = vor.u32 %v652_v16, %v648_v15  ;;  %v3247_v43 = vld [vmem:[%s3498_s17 + $0x58] ss:$0 sps:$4 sm:$0xff]   ;;  %v407_v46 = vshll.u32 %v2767_v33, 16  ;;  %v395_v47 = vrot.slane %v393_v37, 1  ;;  %v384_v48 = vshrl.u32 %v2764_v27, 16 }
  0x2c   : > { %v388_v49 = vrot.slane %v386_v40, 1  ;;  %v400_v50 = vshll.u32 %v2766_v41, 16  ;;  %v405_v52 = vshrl.u32 %v2767_v33, 16  ;;  %v3623_v58 = vld [vmem:[%s3498_s17 + $0x28] sm:$0xf] }
  0x2d   : > { %667 = vrot.lane.b32.xlu1 %v632_v55, %s3400_s19  ;;  %665 = vrot.lane.b32.xlu0 %v625_v56, %s3400_s19  ;;  %v409_v53 = vrot.slane %v407_v46, 1  ;;  %v396_v54 = vor.u32 %v395_v47, %v391_v44  ;;  %v398_v56 = vshrl.u32 %v2766_v41, 16  ;;  %v299_v61 = vld [vmem:[%s3498_s17 + $0x24] sm:$0x1]  ;;  %v3631_v63 = vld [vmem:[%s3498_s17 + $0x38] sm:$0xf] }
  0x2e   : > { %v389_v55 = vor.u32 %v388_v49, %v384_v48  ;;  %v402_v57 = vrot.slane %v400_v50, 1  ;;  %v3276_v3 = vld [vmem:[%s4324_s1 + $0x8] sm:$0x3f]   ;;  %v3639_v6 = vld [vmem:[%s4324_s1] sm:$0x3f]  }
  0x2f   : > { %v410_v62 = vor.u32 %v409_v53, %v405_v52  ;;  %v301_v15 = vld [vmem:[%s3498_s17 + $0x34] sm:$0x1]  ;;  %3172 = vmatprep.subr.msk.bf16.mxu0 %vm758_vm0, %v3276_v3  ;;  %v760_v16 = vsel %vm758_vm0, %v3276_v3, 0  ;;  %v3655_v19 = vld [vmem:[%s4328_s5] sm:$0x3] }
  0x30   : > { %v403_v8 = vor.u32 %v402_v57, %v398_v56  ;;  %3039 = vmatpush3.bf16.msra.mxu0 %v760_v16  ;;  %v3252_v22 = vld [vmem:[%s3498_s17 + $0x70] ss:$0 sps:$4 sm:$0xff]   ;;  %3175 = vmatprep.subr.msk.bf16.mxu1 %vm956_vm1, %v3655_v19  ;;  %v3669_v32 = vsel %vm956_vm1, %v3655_v19, 0  ;;  %v3254_v33 = vld [vmem:[%s3498_s17 + $0x80] ss:$0 sps:$4 sm:$0xff]  }
  0x31   : > { %563 = vrot.lane.b32.xlu1 %v2803_v59, %s3399_s18  ;;  %561 = vrot.lane.b32.xlu0 %v2802_v60, %s3399_s18  ;;  %v300_v59 = vld [vmem:[%s3498_s17 + $0x2c] sm:$0x1]  ;;  %v3627_v60 = vld [vmem:[%s3498_s17 + $0x20] sm:$0xf] }
  0x32   : > { %v2769_v9 = vcombine.low %v3623_v58, %v300_v59  ;;  %v2768_v11 = vcombine.low %v3627_v60, %v299_v61  ;;  %3173 = vmatprep.subr.msk.bf16.mxu0 %vm758_vm0, %v3639_v6  ;;  %3115 = vmatpush3.bf16.msra.mxu1 %v3669_v32  ;;  %v3255_v37 = vld [vmem:[%s3498_s17 + $0x78] ss:$0 sps:$4 sm:$0xff]   ;;  %v3679_v52 = vld [vmem:[%s3498_s17 + $0x10] sm:$0xf]  ;;  %v2858_v53 = vld [vmem:[%s3498_s17 + $0x14] sm:$0x1] }
  0x33   : > { %v2874_v59 = vcombine.low %v3679_v52, %v2858_v53  ;;  %v2860_v3 = vld [vmem:[%s3498_s17 + $0x24] sm:$0x1] }
  0x34   : > { %v421_v26 = vshll.u32 %v2769_v9, 16  ;;  %v414_v27 = vshll.u32 %v2768_v11, 16  ;;  %v412_v41 = vshrl.u32 %v2768_v11, 16 }
  0x35   : > { %671 = vrot.lane.b32.xlu1 %v646_v13, %s3400_s19  ;;  %669 = vrot.lane.b32.xlu0 %v639_v14, %s3400_s19  ;;  %v302_v13 = vld [vmem:[%s3498_s17 + $0x3c] sm:$0x1]  ;;  %v3647_v14 = vld [vmem:[%s3498_s17 + $0x30] sm:$0xf]  ;;  %v1141_v16 = vshll.u32 %v2874_v59, 16 }
  0x36   : > { %v2770_v30 = vcombine.low %v3647_v14, %v301_v15  ;;  %v423_v40 = vrot.slane %v421_v26, 1  ;;  %v3261_v15 = vld [vmem:[%s3498_s17 + $0x50] ss:$0 sps:$4 sm:$0xff]   ;;  %v1139_v26 = vshrl.u32 %v2874_v59, 16  ;;  %v3723_v59 = vld [vmem:[%s3498_s17 + $0x40] sm:$0xf] }
  0x38   : > { %v426_v49 = vshrl.u32 %v2770_v30, 16 }
  0x39   : > { %675 = vrot.lane.b32.xlu1 %v660_v23, %s3400_s19  ;;  %673 = vrot.lane.b32.xlu0 %v653_v25, %s3400_s19  ;;  %v2771_v23 = vcombine.low %v3631_v63, %v302_v13  ;;  %v3253_v25 = vld [vmem:[%s3498_s17 + $0x68] ss:$0 sps:$4 sm:$0xff]   ;;  %v3260_v13 = vld [vmem:[%s3498_s17 + $0x58] ss:$0 sps:$4 sm:$0xff]  }
  0x3b   : > { %v433_v44 = vshrl.u32 %v2771_v23, 16 }
  0x3d   : > { %329 = vrot.lane.b32.xlu1 %v3244_v35, %s3399_s18  ;;  %327 = vrot.lane.b32.xlu0 %v3245_v36, %s3399_s18  ;;  %v419_v35 = vshrl.u32 %v2769_v9, 16  ;;  %v435_v36 = vshll.u32 %v2771_v23, 16  ;;  %v2859_v9 = vld [vmem:[%s3498_s17 + $0x1c] sm:$0x1] }
  0x3f   : > { %v437_v46 = vrot.slane %v435_v36, 1  ;;  %v424_v47 = vor.u32 %v423_v40, %v419_v35 }
  0x41   : > { %333 = vrot.lane.b32.xlu1 %v3246_v42, %s3399_s18  ;;  %331 = vrot.lane.b32.xlu0 %v3247_v43, %s3399_s18  ;;  %v416_v42 = vrot.slane %v414_v27, 1  ;;  %v428_v43 = vshll.u32 %v2770_v30, 16  ;;  %v438_v56 = vor.u32 %v437_v46, %v433_v44  ;;  %v3263_v30 = vld [vmem:[%s3498_s17 + $0x60] ss:$0 sps:$4 sm:$0xff]  }
  0x43   : > { %v417_v48 = vor.u32 %v416_v42, %v412_v41  ;;  %v430_v50 = vrot.slane %v428_v43, 1 }
  0x45   : > { %441 = vrot.lane.b32.xlu1 %v396_v54, %s3400_s19  ;;  %439 = vrot.lane.b32.xlu0 %v389_v55, %s3400_s19  ;;  %v3683_v54 = vld [vmem:[%s3498_s17 + $0x8] sm:$0xf]  ;;  %v2857_v55 = vld [vmem:[%s3498_s17 + $0xc] sm:$0x1]  ;;  %v431_v57 = vor.u32 %v430_v50, %v426_v49 }
  0x46   : > { %v2873_v61 = vcombine.low %v3683_v54, %v2857_v55  ;;  %v3715_v49 = vld [vmem:[%s3498_s17 + $0x28] sm:$0xf]  ;;  %v2861_v50 = vld [vmem:[%s3498_s17 + $0x2c] sm:$0x1] }
  0x48   : > { %v1132_v35 = vshrl.u32 %v2873_v61, 16 }
  0x49   : > { %445 = vrot.lane.b32.xlu1 %v410_v62, %s3400_s19  ;;  %443 = vrot.lane.b32.xlu0 %v403_v8, %s3400_s19  ;;  %v3691_v62 = vld [vmem:[%s3498_s17 + $0x20] sm:$0xf]  ;;  %v3695_v8 = vld [vmem:[%s3498_s17 + $0x18] sm:$0xf] }
  0x4a   : > { %v2876_v11 = vcombine.low %v3691_v62, %v2860_v3  ;;  %v2875_v23 = vcombine.low %v3695_v8, %v2859_v9  ;;  %v3727_v3 = vld [vmem:[%s3498_s17 + $0x38] sm:$0xf]  ;;  %v2863_v9 = vld [vmem:[%s3498_s17 + $0x3c] sm:$0x1] }
  0x4c   : > { %v1155_v27 = vshll.u32 %v2876_v11, 16  ;;  %v1153_v40 = vshrl.u32 %v2876_v11, 16  ;;  %v1146_v44 = vshrl.u32 %v2875_v23, 16 }
  0x4d   : > { %337 = vrot.lane.b32.xlu1 %v3252_v22, %s3399_s18  ;;  %335 = vrot.lane.b32.xlu0 %v3253_v25, %s3399_s18  ;;  %v1134_v22 = vshll.u32 %v2873_v61, 16  ;;  %v3262_v25 = vld [vmem:[%s3498_s17 + $0x68] ss:$0 sps:$4 sm:$0xff]   ;;  %v2864_v61 = vld [vmem:[%s3498_s17 + $0x44] sm:$0x1] }
  0x4e   : > { %v1157_v41 = vrot.slane %v1155_v27, 1  ;;  %v2880_v11 = vcombine.low %v3723_v59, %v2864_v61 }
  0x4f   : > { %v1136_v36 = vrot.slane %v1134_v22, 1 }
  0x50   : > { %v1158_v53 = vor.u32 %v1157_v41, %v1153_v40  ;;  %v1183_v27 = vshll.u32 %v2880_v11, 16  ;;  %v1181_v40 = vshrl.u32 %v2880_v11, 16 }
  0x51   : > { %341 = vrot.lane.b32.xlu1 %v3254_v33, %s3399_s18  ;;  %339 = vrot.lane.b32.xlu0 %v3255_v37, %s3399_s18  ;;  %v1143_v33 = vrot.slane %v1141_v16, 1  ;;  %v1148_v37 = vshll.u32 %v2875_v23, 16  ;;  %v1137_v43 = vor.u32 %v1136_v36, %v1132_v35  ;;  %v2879_v23 = vcombine.low %v3727_v3, %v2863_v9 }
  0x52   : > { %v1185_v41 = vrot.slane %v1183_v27, 1 }
  0x53   : > { %v1144_v42 = vor.u32 %v1143_v33, %v1139_v26  ;;  %v1150_v46 = vrot.slane %v1148_v37, 1  ;;  %v1176_v37 = vshll.u32 %v2879_v23, 16 }
  0x55   : > { %449 = vrot.lane.b32.xlu1 %v424_v47, %s3400_s19  ;;  %447 = vrot.lane.b32.xlu0 %v417_v48, %s3400_s19  ;;  %v3711_v47 = vld [vmem:[%s3498_s17 + $0x30] sm:$0xf]  ;;  %v2862_v48 = vld [vmem:[%s3498_s17 + $0x34] sm:$0x1]  ;;  %v1151_v55 = vor.u32 %v1150_v46, %v1146_v44  ;;  %v1174_v44 = vshrl.u32 %v2879_v23, 16  ;;  %v1178_v46 = vrot.slane %v1176_v37, 1 }
  0x59   : > { %453 = vrot.lane.b32.xlu1 %v438_v56, %s3400_s19  ;;  %451 = vrot.lane.b32.xlu0 %v431_v57, %s3400_s19  ;;  %v2878_v56 = vcombine.low %v3711_v47, %v2862_v48  ;;  %v2877_v57 = vcombine.low %v3715_v49, %v2861_v50  ;;  %v1186_v48 = vor.u32 %v1185_v41, %v1181_v40 }
  0x5a   : > { %v1179_v50 = vor.u32 %v1178_v46, %v1174_v44 }
  0x5b   : > { %v1169_v16 = vshll.u32 %v2878_v56, 16  ;;  %v1162_v22 = vshll.u32 %v2877_v57, 16  ;;  %v1167_v26 = vshrl.u32 %v2878_v56, 16  ;;  %v1160_v35 = vshrl.u32 %v2877_v57, 16 }
  0x5d   : > { %1077 = vrot.lane.b32.xlu1 %v3260_v13, %s3399_s18  ;;  %1075 = vrot.lane.b32.xlu0 %v3261_v15, %s3399_s18  ;;  %v3268_v13 = vld [vmem:[%s3498_s17 + $0x78] ss:$0 sps:$4 sm:$0xff]   ;;  %v3269_v15 = vld [vmem:[%s3498_s17 + $0x70] ss:$0 sps:$4 sm:$0xff]   ;;  %v1171_v33 = vrot.slane %v1169_v16, 1  ;;  %v1164_v36 = vrot.slane %v1162_v22, 1 }
  0x61   : > { %1081 = vrot.lane.b32.xlu1 %v3262_v25, %s3399_s18  ;;  %1079 = vrot.lane.b32.xlu0 %v3263_v30, %s3399_s18  ;;  %v3270_v25 = vld [vmem:[%s3498_s17 + $0x88] ss:$0 sps:$4 sm:$0xff]   ;;  %v3271_v30 = vld [vmem:[%s3498_s17 + $0x80] ss:$0 sps:$4 sm:$0xff]  }
  0x65   : > { %1189 = vrot.lane.b32.xlu1 %v1144_v42, %s3400_s19  ;;  %1187 = vrot.lane.b32.xlu0 %v1137_v43, %s3400_s19  ;;  %v1172_v42 = vor.u32 %v1171_v33, %v1167_v26  ;;  %v1165_v43 = vor.u32 %v1164_v36, %v1160_v35  ;;  %v865_v36 = vsel %vm758_vm0, %v3639_v6, 0 }
  0x69   : > { %1193 = vrot.lane.b32.xlu1 %v1158_v53, %s3400_s19  ;;  %1191 = vrot.lane.b32.xlu0 %v1151_v55, %s3400_s19 }
  0x6d   : > { %1085 = vrot.lane.b32.xlu1 %v3268_v13, %s3399_s18  ;;  %1083 = vrot.lane.b32.xlu0 %v3269_v15, %s3399_s18 }
  0x71   : > { %1089 = vrot.lane.b32.xlu1 %v3270_v25, %s3399_s18  ;;  %1087 = vrot.lane.b32.xlu0 %v3271_v30, %s3399_s18 }
  0x75   : > { %1197 = vrot.lane.b32.xlu1 %v1172_v42, %s3400_s19  ;;  %1195 = vrot.lane.b32.xlu0 %v1165_v43, %s3400_s19 }
  0x79   : > { %1201 = vrot.lane.b32.xlu1 %v1186_v48, %s3400_s19  ;;  %1199 = vrot.lane.b32.xlu0 %v1179_v50, %s3400_s19 }
  0x8f   : > { %v554_v53 = vpop.permute.xlu1 %553  ;;  %v550_v55 = vpop.permute.xlu0 %549 }
  0x90   : > { %v679_v11 = vsel %vm455_vm2, %v3527_v12, %v550_v55  ;;  %v685_v26 = vsel %vm455_vm2, %v3543_v20, %v554_v53 }
  0x93   : > { %v556_v56 = vpop.permute.xlu1 %555  ;;  %v552_v57 = vpop.permute.xlu0 %551 }
  0x94   : > { %v682_v13 = vsel %vm455_vm2, %v3523_v10, %v552_v57  ;;  %v688_v27 = vsel %vm455_vm2, %v3538_v17, %v556_v56 }
  0x97   : > { %v560_v61 = vpop.permute.xlu1 %559  ;;  %v558_v9 = vpop.permute.xlu0 %557 }
  0x98   : > { %v694_v17 = vsel %vm455_vm2, %v3557_v34, %v560_v61  ;;  %v691_v20 = vsel %vm455_vm2, %v3563_v39, %v558_v9 }
  0x9b   : > { %v664_v15 = vpop.permute.xlu1 %663  ;;  %v662_v16 = vpop.permute.xlu0 %661 }
  0x9c   : > { %v704_v22 = vsel %vm480_vm3, %v682_v13, %v664_v15  ;;  %v702_v23 = vsel %vm480_vm3, %v679_v11, %v662_v16 }
  0x9d   : > { %v2814_v25 = vcombine.low %v702_v23, %v704_v22 }
  0x9f   : > { %v668_v30 = vpop.permute.xlu1 %667  ;;  %3040 = vmatprep.mubr.msk.bf16.mxu0 %vm745_vm4, %v2814_v25  ;;  %v666_v12 = vpop.permute.xlu0 %665 }
  0xa0   : > { %v708_v10 = vsel %vm480_vm3, %v688_v27, %v668_v30  ;;  %v706_v33 = vsel %vm480_vm3, %v685_v26, %v666_v12  ;;  %v3278_v30 = vld [vmem:[%s4324_s1 + $0x10] sm:$0x3f]  }
  0xa1   : > { %v2815_v35 = vcombine.low %v706_v33, %v708_v10 }
  0xa3   : > { %v564_v37 = vpop.permute.xlu1 %563  ;;  %3041 = vmatmul.mubr.msk.bf16.vlgmr.msra.gmra.mrb[0].mxu0 %vm745_vm4, %v2815_v35  ;;  %v562_v40 = vpop.permute.xlu0 %561 }
  0xa4   : > { %3049 = vmatpush3.bf16.msra.mxu0 %v865_v36  ;;  %v700_v46 = vsel %vm455_vm2, %v3568_v45, %v564_v37  ;;  %v697_v48 = vsel %vm455_vm2, %v3575_v51, %v562_v40 }
  0xa5   : > { %3174 = vmatprep.subr.msk.bf16.mxu0 %vm956_vm1, %v3655_v19 }
  0xa7   : > { %v672_v41 = vpop.permute.xlu1 %671  ;;  %v670_v42 = vpop.permute.xlu0 %669 }
  0xa8   : > { %v712_v43 = vsel %vm480_vm3, %v694_v17, %v672_v41  ;;  %v710_v6 = vsel %vm480_vm3, %v691_v20, %v670_v42 }
  0xa9   : > { %v2816_v44 = vcombine.low %v710_v6, %v712_v43 }
  0xab   : > { %v676_v19 = vpop.permute.xlu1 %675  ;;  %3044 = vmatprep.mubr.msk.bf16.mxu0 %vm745_vm4, %v2816_v44  ;;  %v674_v34 = vpop.permute.xlu0 %673 }
  0xac   : > { %v716_v50 = vsel %vm480_vm3, %v700_v46, %v676_v19  ;;  %v714_v39 = vsel %vm480_vm3, %v697_v48, %v674_v34  ;;  %v1284_v48 = vsel %vm758_vm0, %v3278_v30, 0 }
  0xad   : > { %v2817_v53 = vcombine.low %v714_v39, %v716_v50 }
  0xaf   : > { %3045 = vmatmul.mubr.msk.bf16.gmra.mrb[4].mxu0 %vm745_vm4, %v2817_v53  ;;  %v330_v55 = vpop.permute.xlu1 %329  ;;  %v328_v56 = vpop.permute.xlu0 %327 }
  0xb0   : > { %v461_v45 = vsel %vm455_vm2, %v3591_v18, %v330_v55  ;;  %v458_v51 = vsel %vm455_vm2, %v3595_v21, %v328_v56 }
  0xb3   : > { %v334_v57 = vpop.permute.xlu1 %333  ;;  %v332_v61 = vpop.permute.xlu0 %331 }
  0xb4   : > { %v467_v22 = vsel %vm455_vm2, %v3599_v24, %v334_v57  ;;  %v464_v23 = vsel %vm455_vm2, %v3607_v31, %v332_v61 }
  0xb7   : > { %v442_v9 = vpop.permute.xlu1 %441  ;;  %v440_v11 = vpop.permute.xlu0 %439 }
  0xb8   : > { %v484_v13 = vsel %vm480_vm3, %v461_v45, %v442_v9  ;;  %v482_v15 = vsel %vm480_vm3, %v458_v51, %v440_v11 }
  0xb9   : > { %v2823_v16 = vcombine.low %v482_v15, %v484_v13 }
  0xbb   : > { %v446_v25 = vpop.permute.xlu1 %445  ;;  %3050 = vmatprep.mubr.msk.bf16.mxu0 %vm745_vm4, %v2823_v16  ;;  %v444_v18 = vpop.permute.xlu0 %443 }
  0xbc   : > { %v488_v26 = vsel %vm480_vm3, %v467_v22, %v446_v25  ;;  %v486_v21 = vsel %vm480_vm3, %v464_v23, %v444_v18 }
  0xbd   : > { %v2824_v27 = vcombine.low %v486_v21, %v488_v26  ;;  %v3401_v26 = vmov 0   ;;  %v1425_v21 = vld [vmem:[#allocation2 + $0x1c] sm:$0x1] }
  0xbe   : > { %1385 = vst.msk [vmem:[#allocation2 + $0x4] sm:$0x1] %vm1384_vm6, %v3401_v26  ;;  %1388 = vst.msk [vmem:[#allocation2 + $0x4c] sm:$0x1] %vm1384_vm6, %v3401_v26 }
  0xbf   : > { %v338_v12 = vpop.permute.xlu1 %337  ;;  %3051 = vmatmul.mubr.msk.bf16.vlgmr.msra.gmra.mrb[0].mxu0 %vm745_vm4, %v2824_v27  ;;  %v336_v24 = vpop.permute.xlu0 %335  ;;  %1383 = vst.msk [vmem:[#allocation2] sm:$0xf] %vm1382_vm5, %v3401_v26  ;;  %1387 = vst.msk [vmem:[#allocation2 + $0x48] sm:$0xf] %vm1382_vm5, %v3401_v26 }
  0xc0   : > { %3059 = vmatpush3.bf16.msra.mxu0 %v3669_v32  ;;  %v473_v33 = vsel %vm455_vm2, %v3623_v58, %v338_v12  ;;  %v470_v35 = vsel %vm455_vm2, %v3627_v60, %v336_v24  ;;  %v1393_v12 = vld [vmem:[#allocation2 + $0x8] sm:$0x1]  ;;  %v1419_v24 = vld [vmem:[#allocation2 + $0xc] sm:$0x1] }
  0xc1   : > { %3176 = vmatprep.subr.msk.bf16.mxu0 %vm758_vm0, %v3278_v30 }
  0xc3   : > { %v342_v31 = vpop.permute.xlu1 %341  ;;  %v340_v10 = vpop.permute.xlu0 %339 }
  0xc4   : > { %v479_v32 = vsel %vm455_vm2, %v3631_v63, %v342_v31  ;;  %v476_v41 = vsel %vm455_vm2, %v3647_v14, %v340_v10  ;;  %v1426_v31 = vsel %vm3857_vm10, 0, %v1425_v21  ;;  %v1394_v10 = vsel %vm3850_vm9, 0, %v1393_v12 }
  0xc5   : > { %1427 = vst [vmem:[#allocation2 + $0x1c] sm:$0x1] %v1426_v31  ;;  %1395 = vst [vmem:[#allocation2 + $0x8] sm:$0x1] %v1394_v10 }
  0xc7   : > { %v450_v36 = vpop.permute.xlu1 %449  ;;  %v448_v37 = vpop.permute.xlu0 %447 }
  0xc8   : > { %v492_v40 = vsel %vm480_vm3, %v473_v33, %v450_v36  ;;  %v490_v17 = vsel %vm480_vm3, %v470_v35, %v448_v37  ;;  %v1420_v33 = vsel %vm3857_vm10, 0, %v1419_v24  ;;  %v1402_v35 = vld [vmem:[#allocation2 + $0x20] sm:$0x1]  ;;  %v1428_v37 = vld [vmem:[#allocation2 + $0x24] sm:$0x1] }
  0xc9   : > { %v2825_v20 = vcombine.low %v490_v17, %v492_v40  ;;  %1421 = vst [vmem:[#allocation2 + $0xc] sm:$0x1] %v1420_v33  ;;  %v1403_v36 = vsel %vm3850_vm9, 0, %v1402_v35  ;;  %v1396_v40 = vld [vmem:[#allocation2 + $0x10] sm:$0x1]  ;;  %v1429_v17 = vsel %vm3857_vm10, 0, %v1428_v37 }
  0xca   : > { %1404 = vst [vmem:[#allocation2 + $0x20] sm:$0x1] %v1403_v36  ;;  %1430 = vst [vmem:[#allocation2 + $0x24] sm:$0x1] %v1429_v17 }
  0xcb   : > { %v454_v42 = vpop.permute.xlu1 %453  ;;  %3054 = vmatprep.mubr.msk.bf16.mxu0 %vm745_vm4, %v2825_v20  ;;  %v452_v58 = vpop.permute.xlu0 %451  ;;  %v1397_v20 = vsel %vm3850_vm9, 0, %v1396_v40 }
  0xcc   : > { %v496_v43 = vsel %vm480_vm3, %v479_v32, %v454_v42  ;;  %v494_v60 = vsel %vm480_vm3, %v476_v41, %v452_v58  ;;  %v1422_v32 = vld [vmem:[#allocation2 + $0x14] sm:$0x1]  ;;  %1398 = vst [vmem:[#allocation2 + $0x10] sm:$0x1] %v1397_v20  ;;  %v3875_v42 = vld [vmem:[#allocation2] sm:$0xf] }
  0xcd   : > { %v2826_v6 = vcombine.low %v494_v60, %v496_v43  ;;  %v1423_v41 = vsel %vm3857_vm10, 0, %v1422_v32  ;;  %v1613_v58 = vld [vmem:[#allocation2 + $0x4] sm:$0x1]  ;;  %v1572_v24 = vld [vmem:[#allocation2 + $0x1c] sm:$0x1] }
  0xce   : > { %1424 = vst [vmem:[#allocation2 + $0x14] sm:$0x1] %v1423_v41  ;;  %v2901_v43 = vcombine.low %v3875_v42, %v1613_v58  ;;  %v1557_v36 = vld [vmem:[#allocation2 + $0x8] sm:$0xf] }
  0xcf   : > { %v1078_v44 = vpop.permute.xlu1 %1077  ;;  %3055 = vmatmul.mubr.msk.bf16.gmra.mrb[4].mxu0 %vm745_vm4, %v2826_v6  ;;  %v1076_v46 = vpop.permute.xlu0 %1075 }
  0xd0   : > { %3060 = vmatprep.mubr.msk.bf16.mxu0 %vm455_vm2, %v2833_v7  ;;  %v1208_v19 = vsel %vm455_vm2, %v3679_v52, %v1078_v44  ;;  %v1205_v34 = vsel %vm455_vm2, %v3683_v54, %v1076_v46  ;;  %v1672_v60 = vshll.u32 %v2901_v43, 16  ;;  %v1670_v6 = vshrl.u32 %v2901_v43, 16  ;;  %v1560_v32 = vld [vmem:[#allocation2 + $0xc] sm:$0x1] }
  0xd2   : > { %v1674_v44 = vrot.slane %v1672_v60, 1 }
  0xd3   : > { %v1082_v63 = vpop.permute.xlu1 %1081  ;;  %v1080_v14 = vpop.permute.xlu0 %1079 }
  0xd4   : > { %v1214_v53 = vsel %vm455_vm2, %v3691_v62, %v1082_v63  ;;  %v1211_v52 = vsel %vm455_vm2, %v3695_v8, %v1080_v14  ;;  %v1675_v46 = vor.u32 %v1674_v44, %v1670_v6  ;;  %v1621_v63 = vld [vmem:[#allocation2] sm:$0xe]  ;;  %v1411_v14 = vld [vmem:[#allocation2 + $0x38] sm:$0x1] }
  0xd5   : > { %v1575_v44 = vld [vmem:[#allocation2 + $0x20] sm:$0xf] }
  0xd6   : > { %1725 = vrot.lane.b32.xlu0 %v1675_v46, %s3400_s19 }
  0xd7   : > { %v1190_v50 = vpop.permute.xlu1 %1189  ;;  %3061 = vmatmul.mubr.msk.bf16.vlgmr.msra.gmra.mrb[8].mxu0 %vm455_vm2, %v2834_v4  ;;  %v1188_v39 = vpop.permute.xlu0 %1187 }
  0xd8   : > { %v1230_v2 = vsel %vm480_vm3, %v1208_v19, %v1190_v50  ;;  %3069 = vmatpush3.bf16.msra.mxu0 %v1284_v48  ;;  %v1228_v5 = vsel %vm480_vm3, %v1205_v34, %v1188_v39  ;;  %v1437_v48 = vld [vmem:[#allocation2 + $0x3c] sm:$0x1]  ;;  %v2909_v19 = vcombine.low %v1621_v63, %v1613_v58  ;;  %v1412_v34 = vsel %vm3850_vm9, 0, %v1411_v14  ;;  %v1405_v39 = vld [vmem:[#allocation2 + $0x28] sm:$0x1] }
  0xd9   : > { %v2883_v7 = vcombine.low %v1228_v5, %v1230_v2  ;;  %v1438_v50 = vsel %vm3857_vm10, 0, %v1437_v48  ;;  %v1431_v2 = vld [vmem:[#allocation2 + $0x2c] sm:$0x1]  ;;  %1413 = vst [vmem:[#allocation2 + $0x38] sm:$0x1] %v1412_v34  ;;  %v1406_v5 = vsel %vm3850_vm9, 0, %v1405_v39 }
  0xda   : > { %1439 = vst [vmem:[#allocation2 + $0x3c] sm:$0x1] %v1438_v50  ;;  %1407 = vst [vmem:[#allocation2 + $0x28] sm:$0x1] %v1406_v5  ;;  %v1578_v14 = vld [vmem:[#allocation2 + $0x24] sm:$0x1] }
  0xdb   : > { %v1194_v54 = vpop.permute.xlu1 %1193  ;;  %3070 = vmatprep.mubr.msk.bf16.mxu0 %vm745_vm4, %v2883_v7  ;;  %v1192_v55 = vpop.permute.xlu0 %1191  ;;  %v1432_v7 = vsel %vm3857_vm10, 0, %v1431_v2  ;;  %v1563_v5 = vld [vmem:[#allocation2 + $0x10] sm:$0xf] }
  0xdc   : > { %v1234_v0 = vsel %vm480_vm3, %v1214_v53, %v1194_v54  ;;  %v1232_v1 = vsel %vm480_vm3, %v1211_v52, %v1192_v55  ;;  %v1414_v53 = vld [vmem:[#allocation2 + $0x40] sm:$0x1]  ;;  %v1440_v52 = vld [vmem:[#allocation2 + $0x44] sm:$0x1]  ;;  %1433 = vst [vmem:[#allocation2 + $0x2c] sm:$0x1] %v1432_v7 }
  0xdd   : > { %v2884_v4 = vcombine.low %v1232_v1, %v1234_v0  ;;  %v1415_v54 = vsel %vm3850_vm9, 0, %v1414_v53  ;;  %v1441_v55 = vsel %vm3857_vm10, 0, %v1440_v52  ;;  %v1408_v0 = vld [vmem:[#allocation2 + $0x30] sm:$0x1]  ;;  %v1434_v1 = vld [vmem:[#allocation2 + $0x34] sm:$0x1] }
  0xde   : > { %1416 = vst [vmem:[#allocation2 + $0x40] sm:$0x1] %v1415_v54  ;;  %1442 = vst [vmem:[#allocation2 + $0x44] sm:$0x1] %v1441_v55  ;;  %v1566_v7 = vld [vmem:[#allocation2 + $0x14] sm:$0x1] }
  0xdf   : > { %v1086_v56 = vpop.permute.xlu1 %1085  ;;  %3071 = vmatmul.mubr.msk.bf16.vlgmr.msra.gmra.mrb[0].mxu0 %vm745_vm4, %v2884_v4  ;;  %v1084_v57 = vpop.permute.xlu0 %1083  ;;  %v1409_v4 = vsel %vm3850_vm9, 0, %v1408_v0 }
  0xe0   : > { %v1220_v62 = vsel %vm455_vm2, %v3711_v47, %v1086_v56  ;;  %v1217_v8 = vsel %vm455_vm2, %v3715_v49, %v1084_v57  ;;  %v1435_v56 = vsel %vm3857_vm10, 0, %v1434_v1  ;;  %v1765_v57 = vrot.slane %v2909_v19, 1  ;;  %1410 = vst [vmem:[#allocation2 + $0x30] sm:$0x1] %v1409_v4 }
  0xe1   : > { %1436 = vst [vmem:[#allocation2 + $0x34] sm:$0x1] %v1435_v56 }
  0xe2   : > { %1773 = vrot.lane.b32.xlu0 %v1765_v57, %s3402_s14 }
  0xe3   : > { %v1090_v61 = vpop.permute.xlu1 %1089  ;;  %v1088_v45 = vpop.permute.xlu0 %1087 }
  0xe4   : > { %v1226_v15 = vsel %vm455_vm2, %v3723_v59, %v1090_v61  ;;  %v1223_v16 = vsel %vm455_vm2, %v3727_v3, %v1088_v45  ;;  %v1399_v3 = vld [vmem:[#allocation2 + $0x18] sm:$0x1] }
  0xe5   : > { %v1400_v27 = vsel %vm3850_vm9, 0, %v1399_v3 }
  0xe6   : > { %1401 = vst [vmem:[#allocation2 + $0x18] sm:$0x1] %v1400_v27 }
  0xe7   : > { %v1198_v51 = vpop.permute.xlu1 %1197  ;;  %v1196_v9 = vpop.permute.xlu0 %1195 }
  0xe8   : > { %v1238_v11 = vsel %vm480_vm3, %v1220_v62, %v1198_v51  ;;  %v1236_v13 = vsel %vm480_vm3, %v1217_v8, %v1196_v9  ;;  %v3907_v51 = vld [vmem:[%s4325_s2] ss:$0 sm:$0xff] }
  0xe9   : > { %v2885_v22 = vcombine.low %v1236_v13, %v1238_v11 }
  0xeb   : > { %v1202_v23 = vpop.permute.xlu1 %1201  ;;  %v1200_v25 = vpop.permute.xlu0 %1199  ;;  %3074 = vmatprep.mubr.msk.bf16.mxu0 %vm745_vm4, %v2885_v22 }
  0xec   : > { %v1242_v47 = vsel %vm480_vm3, %v1226_v15, %v1202_v23  ;;  %v1240_v49 = vsel %vm480_vm3, %v1223_v16, %v1200_v25 }
  0xed   : > { %v2886_v18 = vcombine.low %v1240_v49, %v1242_v47  ;;  %v1569_v12 = vld [vmem:[#allocation2 + $0x18] sm:$0xf] }
  0xef   : > { %3075 = vmatmul.mubr.msk.bf16.gmra.mrb[4].mxu0 %vm745_vm4, %v2886_v18 }
 0x1aa   : > { %v3896_v61 = vpop.f32.mrb[8].mxu0 }
 0x1ab   : > { %v3898_v45 = vpop.f32.mrb[9].mxu0 }
 0x1ac   : > { %v3900_v62 = vpop.f32.mrb[10].mxu0 }
 0x1ad   : > { %v3902_v8 = vpop.f32.mrb[11].mxu0 }
 0x1b2   : > { %v3072_v9 = vpop.f32.mrb[0].mxu0 }
 0x1b3   : > { %v1368_v11 = vadd.f32 %v3072_v9, %v3907_v51  ;;  %v1320_v13 = vpop.f32.mrb[1].mxu0 }
 0x1b4   : > { %v1366_v15 = vadd.f32 %v3907_v51, %v1320_v13  ;;  %v3073_v16 = vpop.f32.mrb[2].mxu0 }
 0x1b5   : > { %v1376_v22 = vmax.f32 %v1368_v11, 0.0  ;;  %v1369_v23 = vadd.f32 %v3073_v16, %v3907_v51  ;;  %v1323_v25 = vpop.f32.mrb[3].mxu0 }
 0x1b6   : > { %v1374_v47 = vmax.f32 %v1366_v15, 0.0  ;;  %v1367_v49 = vadd.f32 %v3907_v51, %v1323_v25 }
 0x1b7   : > { %v2993_v18 = vpack.c.bf16 %v1376_v22, %v1376_v22  ;;  %v1377_v26 = vmax.f32 %v1369_v23, 0.0 }
 0x1b8   : > { %v2991_v3 = vpack.c.bf16 %v1374_v47, %v1374_v47  ;;  %v1375_v21 = vmax.f32 %v1367_v49, 0.0 }
 0x1b9   : > { %v1492_v27 = vshrl.u32 %v2993_v18, 16  ;;  %v2994_v30 = vpack.c.bf16 %v1377_v26, %v1377_v26  ;;  %v1495_v35 = vshll.u32 %v2993_v18, 16 }
 0x1ba   : > { %v1476_v31 = vshrl.u32 %v2991_v3, 16  ;;  %v2992_v10 = vpack.c.bf16 %v1375_v21, %v1375_v21  ;;  %v1479_v20 = vshll.u32 %v2991_v3, 16 }
 0x1bb   : > { %v1494_v33 = vrot.slane %v1492_v27, 7  ;;  %v1500_v37 = vshrl.u32 %v2994_v30, 16  ;;  %v1503_v6 = vshll.u32 %v2994_v30, 16 }
 0x1bc   : > { %v1478_v17 = vrot.slane %v1476_v31, 7  ;;  %v1484_v41 = vshrl.u32 %v2992_v10, 16  ;;  %v1487_v19 = vshll.u32 %v2992_v10, 16 }
 0x1bd   : > { %v1497_v58 = vor.u32 %v1495_v35, %v1494_v33  ;;  %v1498_v43 = vrot.slane %v1494_v33, 4  ;;  %v1502_v60 = vrot.slane %v1500_v37, 7  ;;  %v1593_v35 = vld [vmem:[#allocation2 + $0x38] sm:$0xf] }
 0x1be   : > { %v1481_v46 = vor.u32 %v1479_v20, %v1478_v17  ;;  %v1482_v63 = vrot.slane %v1478_v17, 4  ;;  %v1486_v48 = vrot.slane %v1484_v41, 7  ;;  %v1581_v41 = vld [vmem:[#allocation2 + $0x28] sm:$0xf] }
 0x1bf   : > { %v1570_v34 = vsel %vm3915_vm11, %v1497_v58, %v1569_v12  ;;  %v1573_v50 = vsel %vm3850_vm9, %v1498_v43, %v1572_v24  ;;  %v1505_v39 = vor.u32 %v1503_v6, %v1502_v60  ;;  %v1506_v2 = vrot.slane %v1502_v60, 4  ;;  %v1584_v58 = vld [vmem:[#allocation2 + $0x2c] sm:$0x1] }
 0x1c0   : > { %1571 = vst [vmem:[#allocation2 + $0x18] sm:$0xf] %v1570_v34  ;;  %1574 = vst [vmem:[#allocation2 + $0x1c] sm:$0x1] %v1573_v50  ;;  %v1558_v53 = vsel %vm3915_vm11, %v1481_v46, %v1557_v36  ;;  %v1561_v52 = vsel %vm3850_vm9, %v1482_v63, %v1560_v32  ;;  %v1489_v54 = vor.u32 %v1487_v19, %v1486_v48  ;;  %v1490_v55 = vrot.slane %v1486_v48, 4 }
 0x1c1   : > { %1559 = vst [vmem:[#allocation2 + $0x8] sm:$0xf] %v1558_v53  ;;  %1562 = vst [vmem:[#allocation2 + $0xc] sm:$0x1] %v1561_v52  ;;  %v1576_v0 = vsel %vm3915_vm11, %v1505_v39, %v1575_v44  ;;  %v1579_v1 = vsel %vm3850_vm9, %v1506_v2, %v1578_v14  ;;  %v1596_v36 = vld [vmem:[#allocation2 + $0x3c] sm:$0x1] }
 0x1c2   : > { %1577 = vst [vmem:[#allocation2 + $0x20] sm:$0xf] %v1576_v0  ;;  %1580 = vst [vmem:[#allocation2 + $0x24] sm:$0x1] %v1579_v1  ;;  %v1564_v4 = vsel %vm3915_vm11, %v1489_v54, %v1563_v5  ;;  %v1567_v56 = vsel %vm3850_vm9, %v1490_v55, %v1566_v7  ;;  %v3076_v57 = vpop.f32.mrb[4].mxu0 }
 0x1c3   : > { %1565 = vst [vmem:[#allocation2 + $0x10] sm:$0xf] %v1564_v4  ;;  %1568 = vst [vmem:[#allocation2 + $0x14] sm:$0x1] %v1567_v56  ;;  %v1372_v9 = vadd.f32 %v3076_v57, %v3907_v51  ;;  %v1336_v11 = vpop.f32.mrb[5].mxu0 }
 0x1c4   : > { %v1370_v13 = vadd.f32 %v3907_v51, %v1336_v11  ;;  %v3077_v15 = vpop.f32.mrb[6].mxu0  ;;  %v1599_v14 = vld [vmem:[#allocation2 + $0x40] sm:$0xf]  ;;  %v1602_v48 = vld [vmem:[#allocation2 + $0x44] sm:$0x1] }
 0x1c5   : > { %v1380_v16 = vmax.f32 %v1372_v9, 0.0  ;;  %v1373_v22 = vadd.f32 %v3077_v15, %v3907_v51  ;;  %v1339_v23 = vpop.f32.mrb[7].mxu0  ;;  %v1587_v5 = vld [vmem:[#allocation2 + $0x30] sm:$0xf]  ;;  %v1590_v55 = vld [vmem:[#allocation2 + $0x34] sm:$0x1] }
 0x1c6   : > { %v1378_v25 = vmax.f32 %v1370_v13, 0.0  ;;  %v1371_v47 = vadd.f32 %v3907_v51, %v1339_v23 }
 0x1c7   : > { %v2997_v49 = vpack.c.bf16 %v1380_v16, %v1380_v16  ;;  %v1381_v18 = vmax.f32 %v1373_v22, 0.0  ;;  %v3939_v26 = vld [vmem:[#allocation2 + $0x1c] sm:$0x1]  ;;  %v1851_v3 = vld [vmem:[#allocation2 + $0x18] sm:$0xe] }
 0x1c8   : > { %v2995_v21 = vpack.c.bf16 %v1378_v25, %v1378_v25  ;;  %v1379_v27 = vmax.f32 %v1371_v47, 0.0  ;;  %v2927_v30 = vcombine.low %v1851_v3, %v3939_v26  ;;  %v3942_v12 = vld [vmem:[#allocation2 + $0x1c] sm:$0x1]  ;;  %v1624_v33 = vld [vmem:[#allocation2 + $0x18] sm:$0xe] }
 0x1c9   : > { %v1524_v24 = vshrl.u32 %v2997_v49, 16  ;;  %v1527_v31 = vshll.u32 %v2997_v49, 16  ;;  %v2998_v10 = vpack.c.bf16 %v1381_v18, %v1381_v18  ;;  %v2912_v60 = vcombine.low %v1624_v33, %v3942_v12  ;;  %v1841_v6 = vld [vmem:[#allocation2 + $0xc] sm:$0x1]  ;;  %v1849_v44 = vld [vmem:[#allocation2 + $0x8] sm:$0xe] }
 0x1ca   : > { %v1508_v37 = vshrl.u32 %v2995_v21, 16  ;;  %v1511_v17 = vshll.u32 %v2995_v21, 16  ;;  %v2996_v51 = vpack.c.bf16 %v1379_v27, %v1379_v27  ;;  %v1995_v20 = vrot.slane %v2927_v30, 1  ;;  %v3946_v0 = vld [vmem:[#allocation2 + $0x18] sm:$0xf] }
 0x1cb   : > { %v1526_v32 = vrot.slane %v1524_v24, 7  ;;  %v1532_v43 = vshrl.u32 %v2998_v10, 16  ;;  %v1535_v63 = vshll.u32 %v2998_v10, 16  ;;  %v1768_v7 = vrot.slane %v2912_v60, 1  ;;  %v3953_v11 = vld [vmem:[#allocation2 + $0x18] sm:$0xf] }
 0x1cc   : > { %v1510_v46 = vrot.slane %v1508_v37, 7  ;;  %v1516_v19 = vshrl.u32 %v2996_v51, 16  ;;  %v1519_v34 = vshll.u32 %v2996_v51, 16  ;;  %2005 = vrot.lane.b32.xlu0 %v1995_v20, %s3402_s14  ;;  %v2925_v1 = vcombine.low %v1849_v44, %v1841_v6  ;;  %v1614_v13 = vld [vmem:[#allocation2 + $0xc] sm:$0x1] }
 0x1cd   : > { %v1529_v50 = vor.u32 %v1527_v31, %v1526_v32  ;;  %v1530_v39 = vrot.slane %v1526_v32, 4  ;;  %v1534_v2 = vrot.slane %v1532_v43, 7  ;;  %1779 = vrot.lane.b32.xlu1 %v1768_v7, %s3402_s14  ;;  %v1622_v15 = vld [vmem:[#allocation2 + $0x8] sm:$0xe]  ;;  %v1844_v47 = vld [vmem:[#allocation2 + $0x24] sm:$0x1]  ;;  %v2904_v40 = vcombine.low %v3953_v11, %v3942_v12 }
 0x1ce   : > { %v1513_v53 = vor.u32 %v1511_v17, %v1510_v46  ;;  %v1514_v52 = vrot.slane %v1510_v46, 4  ;;  %v1518_v54 = vrot.slane %v1516_v19, 7  ;;  %v1617_v49 = vld [vmem:[#allocation2 + $0x24] sm:$0x1]  ;;  %v1993_v21 = vrot.slane %v2925_v1, 1 }
 0x1cf   : > { %v1594_v4 = vsel %vm3915_vm11, %v1529_v50, %v1593_v35  ;;  %v1597_v56 = vsel %vm3850_vm9, %v1530_v39, %v1596_v36  ;;  %v1537_v57 = vor.u32 %v1535_v63, %v1534_v2  ;;  %v1538_v9 = vrot.slane %v1534_v2, 4  ;;  %v1852_v27 = vld [vmem:[#allocation2 + $0x20] sm:$0xe]  ;;  %v3967_v10 = vld [vmem:[#allocation2 + $0x8] sm:$0xf] }
 0x1d0   : > { %1595 = vst [vmem:[#allocation2 + $0x38] sm:$0xf] %v1594_v4  ;;  %1598 = vst [vmem:[#allocation2 + $0x3c] sm:$0x1] %v1597_v56  ;;  %v1582_v16 = vsel %vm3915_vm11, %v1513_v53, %v1581_v41  ;;  %v1585_v22 = vsel %vm3850_vm9, %v1514_v52, %v1584_v58  ;;  %v1521_v23 = vor.u32 %v1519_v34, %v1518_v54  ;;  %v1522_v25 = vrot.slane %v1518_v54, 4 }
 0x1d1   : > { %1583 = vst [vmem:[#allocation2 + $0x28] sm:$0xf] %v1582_v16  ;;  %1586 = vst [vmem:[#allocation2 + $0x2c] sm:$0x1] %v1585_v22  ;;  %v1600_v18 = vsel %vm3915_vm11, %v1537_v57, %v1599_v14  ;;  %v1603_v3 = vsel %vm3850_vm9, %v1538_v9, %v1602_v48  ;;  %v1625_v30 = vld [vmem:[#allocation2 + $0x20] sm:$0xe]  ;;  %v2910_v33 = vcombine.low %v1622_v15, %v1614_v13  ;;  %2001 = vrot.lane.b32.xlu0 %v1993_v21, %s3402_s14 }
 0x1d2   : > { %1601 = vst [vmem:[#allocation2 + $0x40] sm:$0xf] %v1600_v18  ;;  %1604 = vst [vmem:[#allocation2 + $0x44] sm:$0x1] %v1603_v3  ;;  %v1588_v24 = vsel %vm3915_vm11, %v1521_v23, %v1587_v5  ;;  %v1591_v31 = vsel %vm3850_vm9, %v1522_v25, %v1590_v55  ;;  %v2919_v35 = vcombine.low %v3946_v0, %v3939_v26  ;;  %v1615_v37 = vld [vmem:[#allocation2 + $0x14] sm:$0x1] }
 0x1d3   : > { %1589 = vst [vmem:[#allocation2 + $0x30] sm:$0xf] %v1588_v24  ;;  %1592 = vst [vmem:[#allocation2 + $0x34] sm:$0x1] %v1591_v31  ;;  %v2913_v36 = vcombine.low %v1625_v30, %v1617_v49  ;;  %v1623_v17 = vld [vmem:[#allocation2 + $0x10] sm:$0xe]  ;;  %v2928_v59 = vcombine.low %v1852_v27, %v1844_v47  ;;  %v2917_v32 = vcombine.low %v3967_v10, %v1841_v6 }
 0x1d4   : > { %v1766_v51 = vrot.slane %v2910_v33, 1  ;;  %v3974_v20 = vld [vmem:[#allocation2 + $0x8] sm:$0xf]  ;;  %v1842_v58 = vld [vmem:[#allocation2 + $0x14] sm:$0x1]  ;;  %v2911_v60 = vcombine.low %v1623_v17, %v1615_v37  ;;  %v1914_v44 = vshll.u32 %v2919_v35, 16 }
 0x1d5   : > { %v1769_v41 = vrot.slane %v2913_v36, 1  ;;  %v1850_v43 = vld [vmem:[#allocation2 + $0x10] sm:$0xe]  ;;  %v3978_v26 = vld [vmem:[#allocation2 + $0x20] sm:$0xf]  ;;  %v2902_v46 = vcombine.low %v3974_v20, %v1614_v13  ;;  %v1996_v12 = vrot.slane %v2928_v59, 1 }
 0x1d6   : > { %1775 = vrot.lane.b32.xlu1 %v1766_v51, %s3402_s14  ;;  %v2926_v63 = vcombine.low %v1850_v43, %v1842_v58  ;;  %v1693_v14 = vshll.u32 %v2904_v40, 16  ;;  %v3982_v48 = vld [vmem:[#allocation2 + $0x20] sm:$0xf]  ;;  %v2905_v6 = vcombine.low %v3978_v26, %v1617_v49  ;;  %v1767_v19 = vrot.slane %v2911_v60, 1  ;;  %v3986_v39 = vld [vmem:[#allocation2 + $0x10] sm:$0xf] }
 0x1d7   : > { %1781 = vrot.lane.b32.xlu0 %v1769_v41, %s3402_s14  ;;  %v1916_v34 = vrot.slane %v1914_v44, 1  ;;  %v1900_v50 = vshll.u32 %v2917_v32, 16  ;;  %v1912_v2 = vshrl.u32 %v2919_v35, 16  ;;  %v2920_v5 = vcombine.low %v3982_v48, %v1844_v47  ;;  %v3990_v54 = vld [vmem:[#allocation2 + $0x10] sm:$0xf] }
 0x1d8   : > { %v1994_v7 = vrot.slane %v2926_v63, 1  ;;  %v1695_v53 = vrot.slane %v1693_v14, 1  ;;  %v1679_v52 = vshll.u32 %v2902_v46, 16  ;;  %v2903_v55 = vcombine.low %v3986_v39, %v1615_v37  ;;  %v3998_v13 = vld [vmem:[%s4326_s3 + $0xc] sm:$0xff]   ;;  %v1847_v33 = vld [vmem:[#allocation2 + $0x3c] sm:$0x1] }
 0x1d9   : > { %v1917_v1 = vor.u32 %v1916_v34, %v1912_v2  ;;  %v1902_v4 = vrot.slane %v1900_v50, 1  ;;  %v1700_v56 = vshll.u32 %v2905_v6, 16  ;;  %v1691_v57 = vshrl.u32 %v2904_v40, 16  ;;  %3078 = vmatprep.subr.bf16.mxu1 %v3998_v13  ;;  %v1855_v35 = vld [vmem:[#allocation2 + $0x38] sm:$0xe] }
 0x1da   : > { %2007 = vrot.lane.b32.xlu1 %v1996_v12, %s3402_s14  ;;  %v1898_v9 = vshrl.u32 %v2917_v32, 16  ;;  %v2918_v15 = vcombine.low %v3990_v54, %v1842_v58  ;;  %v1681_v22 = vrot.slane %v1679_v52, 1  ;;  %v1921_v23 = vshll.u32 %v2920_v5, 16  ;;  %v4006_v32 = vld [vmem:[#allocation2 + $0x38] sm:$0xf] }
 0x1db   : > { %1777 = vrot.lane.b32.xlu0 %v1767_v19, %s3402_s14  ;;  %v1696_v16 = vor.u32 %v1695_v53, %v1691_v57  ;;  %v1702_v47 = vrot.slane %v1700_v56, 1  ;;  %v1686_v49 = vshll.u32 %v2903_v55, 16  ;;  %v1677_v18 = vshrl.u32 %v2902_v46, 16  ;;  %v1618_v41 = vld [vmem:[#allocation2 + $0x2c] sm:$0x1] }
 0x1dc   : > { %v1903_v25 = vor.u32 %v1902_v4, %v1898_v9  ;;  %v1698_v3 = vshrl.u32 %v2905_v6, 16  ;;  %v1923_v27 = vrot.slane %v1921_v23, 1  ;;  %v1907_v30 = vshll.u32 %v2918_v15, 16  ;;  %v1626_v58 = vld [vmem:[#allocation2 + $0x28] sm:$0xe] }
 0x1dd   : > { %v1682_v21 = vor.u32 %v1681_v22, %v1677_v18  ;;  %v1688_v31 = vrot.slane %v1686_v49, 1  ;;  %v1919_v36 = vshrl.u32 %v2920_v5, 16  ;;  %v1684_v37 = vshrl.u32 %v2903_v55, 16  ;;  %v1845_v60 = vld [vmem:[#allocation2 + $0x2c] sm:$0x1] }
 0x1de   : > { %2003 = vrot.lane.b32.xlu1 %v1994_v7, %s3402_s14  ;;  %v1703_v24 = vor.u32 %v1702_v47, %v1698_v3  ;;  %v1909_v40 = vrot.slane %v1907_v30, 1  ;;  %v2931_v51 = vcombine.low %v1855_v35, %v1847_v33  ;;  %v1905_v43 = vshrl.u32 %v2918_v15, 16  ;;  %v1853_v44 = vld [vmem:[#allocation2 + $0x28] sm:$0xe]  ;;  %v1848_v46 = vld [vmem:[#allocation2 + $0x44] sm:$0x1] }
 0x1df   : > { %1957 = vrot.lane.b32.xlu0 %v1917_v1, %s3400_s19  ;;  %v1924_v17 = vor.u32 %v1923_v27, %v1919_v36  ;;  %v1689_v59 = vor.u32 %v1688_v31, %v1684_v37  ;;  %v2914_v14 = vcombine.low %v1626_v58, %v1618_v41  ;;  %v1856_v6 = vld [vmem:[#allocation2 + $0x40] sm:$0xe]  ;;  %v4010_v19 = vld [vmem:[#allocation2 + $0x34] sm:$0x1]  ;;  %v2923_v34 = vcombine.low %v4006_v32, %v1847_v33  ;;  %v1627_v2 = vld [vmem:[#allocation2 + $0x30] sm:$0xe] }
 0x1e0   : > { %v1910_v12 = vor.u32 %v1909_v40, %v1905_v43  ;;  %v1999_v63 = vrot.slane %v2931_v51, 1  ;;  %v2929_v50 = vcombine.low %v1853_v44, %v1845_v60  ;;  %v4013_v5 = vld [vmem:[#allocation2 + $0x38] sm:$0xf]  ;;  %v4015_v7 = vld [vmem:[#allocation2 + $0x3c] sm:$0x1]  ;;  %v2932_v1 = vcombine.low %v1856_v6, %v1848_v46 }
 0x1e1   : > { %v4018_v53 = vld [vmem:[#allocation2 + $0x28] sm:$0xf]  ;;  %v1770_v52 = vrot.slane %v2914_v14, 1  ;;  %v2915_v4 = vcombine.low %v1627_v2, %v4010_v19  ;;  %v2908_v56 = vcombine.low %v4013_v5, %v4015_v7  ;;  %v1846_v15 = vld [vmem:[#allocation2 + $0x34] sm:$0x1]  ;;  %v1942_v22 = vshll.u32 %v2923_v34, 16 }
 0x1e2   : > { %1731 = vrot.lane.b32.xlu1 %v1696_v16, %s3400_s19  ;;  %v4021_v55 = vld [vmem:[#allocation2 + $0x28] sm:$0xf]  ;;  %v1997_v57 = vrot.slane %v2929_v50, 1  ;;  %v2921_v9 = vcombine.low %v4018_v53, %v1845_v60  ;;  %v1854_v16 = vld [vmem:[#allocation2 + $0x30] sm:$0xe]  ;;  %v2000_v49 = vrot.slane %v2932_v1, 1 }
 0x1e3   : > { %1953 = vrot.lane.b32.xlu0 %v1903_v25, %s3400_s19  ;;  %v4028_v23 = vld [vmem:[#allocation2 + $0x10] sm:$0xf]  ;;  %v4030_v25 = vld [vmem:[#allocation2 + $0x14] sm:$0x1]  ;;  %v2906_v47 = vcombine.low %v4021_v55, %v1618_v41  ;;  %v2930_v18 = vcombine.low %v1854_v16, %v1846_v15  ;;  %v1771_v3 = vrot.slane %v2915_v4, 1  ;;  %v1944_v30 = vrot.slane %v1942_v22, 1 }
 0x1e4   : > { %v4034_v27 = vld [vmem:[#allocation2 + $0x40] sm:$0xf]  ;;  %v2956_v31 = vcombine.low %v4028_v23, %v4030_v25  ;;  %v3334_v35 = vld [vmem:[%s3498_s17 + $0xf8] sm:$0xf]  ;;  %v3328_v40 = vld [vmem:[%s4326_s3 + $0x14] ss:$0 sps:$4 sm:$0xff]  }
 0x1e5   : > { %v3333_v33 = vld [vmem:[%s3498_s17 + $0x100] sm:$0xf]  ;;  %v1940_v51 = vshrl.u32 %v2923_v34, 16  ;;  %v1998_v41 = vrot.slane %v2930_v18, 1  ;;  %v1707_v43 = vshll.u32 %v2906_v47, 16  ;;  %v2105_v6 = vsel %vm2103_vm12, %v3328_v40, 0 }
 0x1e6   : > { %1727 = vrot.lane.b32.xlu1 %v1682_v21, %s3400_s19  ;;  %v1721_v21 = vshll.u32 %v2908_v56, 16  ;;  %v2835_v36 = vcombine.low %v3334_v35, %v3333_v33  ;;  %v4041_v37 = vld [vmem:[#allocation2 + $0x20] sm:$0xf]  ;;  %v4055_v60 = vld [vmem:[#allocation2 + $0x30] sm:$0xf]  ;;  %v1926_v28 = vshrl.u32 %v2921_v9, 16 }
 0x1e7   : > { %1733 = vrot.lane.b32.xlu0 %v1703_v24, %s3400_s19  ;;  %v1928_v24 = vshll.u32 %v2921_v9, 16  ;;  %v1945_v44 = vor.u32 %v1944_v30, %v1940_v51  ;;  %v1709_v50 = vrot.slane %v1707_v43, 1  ;;  %v4070_v4 = vld [vmem:[#allocation2 + $0x30] sm:$0xf]  ;;  %v1628_v35 = vld [vmem:[#allocation2 + $0x38] sm:$0xe] }
 0x1e8   : > { %3064 = vmatprep.mubr.msk.bf16.mxu1 %vm455_vm2, %v2835_v36  ;;  %v1723_v58 = vrot.slane %v1721_v21, 1  ;;  %v2907_v22 = vcombine.low %v4070_v4, %v4010_v19  ;;  %v4079_v21 = vld [vmem:[#allocation2 + $0x1c] sm:$0x1]  ;;  %v2298_v30 = vld [vmem:[#allocation2 + $0x10] sm:$0xe]  ;;  %s2746_s17 = sshll.u32 %s269_s21, 5 }
 0x1e9   : > { %3065 = vmatmul.mubr.msk.bf16.vlgmr.msra.gmra.mrb[0].mxu1 %vm455_vm2, %v2836_v38  ;;  %v2922_v38 = vcombine.low %v4055_v60, %v1846_v15  ;;  %v4091_v43 = vld [vmem:[#allocation2 + $0x40] sm:$0xf]  ;;  %s271_s29 = scalar_lea.vmem [#allocation3], %s2746_s17 }
 0x1ea   : > { %1959 = vrot.lane.b32.xlu1 %v1924_v17, %s3400_s19  ;;  %v4043_v17 = vld [vmem:[#allocation2 + $0x24] sm:$0x1]  ;;  %3079 = vmatpush3.bf16.msra.mxu1 %v3998_v13  ;;  %v1714_v51 = vshll.u32 %v2907_v22, 16  ;;  %s2680_s8 = sshll.u32 %s271_s29, 4  ;;  %s4275_s8 = int_to_ptr.vmem [resolvable:$true] %s2680_s8 }
 0x1eb   : > { %1729 = vrot.lane.b32.xlu0 %v1689_v59, %s3400_s19  ;;  %v2924_v59 = vcombine.low %v4034_v27, %v1848_v46  ;;  %v2958_v14 = vcombine.low %v4041_v37, %v4043_v17  ;;  %v1719_v46 = vshrl.u32 %v2908_v56, 16  ;;  %3177 = vmatprep.subr.msk.bf16.mxu1 %vm2103_vm12, %v3328_v40  ;;  %v1705_v56 = vshrl.u32 %v2906_v47, 16  ;;  %s3335_s15 = scalar_lea.vmem %s4275_s8, 512  ;;  %p3342_p0 = scmp.lt.s32.totalorder %s4275_s8, %s3340_s20 }
 0x1ec   : > { %v1935_v15 = vshll.u32 %v2922_v38, 16  ;;  %v2964_v40 = vcombine.low %v2298_v30, %v4030_v25  ;;  %v4109_v30 = vld [vmem:[#allocation2 + $0x38] sm:$0xf]  ;;  %p3336_p11 = scmp.ne.s32.totalorder %s4275_s8, %s3335_s15  ;;  %p3343_p1 = scmp.lt.s32.totalorder %s3341_s22, %s3335_s15 }
 0x1ed   : > { %v1724_v34 = vor.u32 %v1723_v58, %v1719_v46  ;;  %v1949_v13 = vshll.u32 %v2924_v59, 16  ;;  %v2363_v1 = vshll.u32 %v2958_v14, 16  ;;  %v1710_v9 = vor.u32 %v1709_v50, %v1705_v56  ;;  %v4088_v58 = vld [vmem:[#allocation2 + $0x2c] sm:$0x1] }
 0x1ee   : > { %1955 = vrot.lane.b32.xlu1 %v1910_v12, %s3400_s19  ;;  %v1930_v12 = vrot.slane %v1928_v24, 1  ;;  %3081 = vmatpush3.bf16.msra.mxu1 %v2105_v6  ;;  %v1947_v47 = vshrl.u32 %v2924_v59, 16  ;;  %v2361_v24 = vshrl.u32 %v2958_v14, 16  ;;  %v1937_v33 = vrot.slane %v1935_v15, 1  ;;  %p3337_p12 = pnand %p3336_p11, %p3483_p5  ;;  %p3344_p2 = por %p3343_p1, %p3342_p0 }
 0x1ef   : > { %2013 = vrot.lane.b32.xlu0 %v1999_v63, %s3402_s14  ;;  %v2349_v63 = vshll.u32 %v2956_v31, 16  ;;  %3090 = vmatprep.subr.bf16.mxu1 %v4067_v29  ;;  %v1951_v16 = vrot.slane %v1949_v13, 1  ;;  %v2365_v18 = vrot.slane %v2363_v1, 1  ;;  %v1933_v59 = vshrl.u32 %v2922_v38, 16  ;;  %v2300_v38 = vld [vmem:[#allocation2 + $0x20] sm:$0xe] }
 0x1f0   : > { %v1931_v2 = vor.u32 %v1930_v12, %v1926_v28  ;;  %v2442_v46 = vrot.slane %v2964_v40, 1  ;;  %v1716_v6 = vrot.slane %v1714_v51, 1  ;;  %p3338_p13 = pneg %p3337_p12 }
 0x1f1   : > { %v2366_v19 = vor.u32 %v2365_v18, %v2361_v24  ;;  %v1938_v12 = vor.u32 %v1937_v33, %v1933_v59  ;;  %v2295_v24 = vld [vmem:[#allocation2 + $0x3c] sm:$0x1] }
 0x1f2   : > { %1783 = vrot.lane.b32.xlu1 %v1770_v52, %s3402_s14  ;;  %v2351_v52 = vrot.slane %v2349_v63, 1  ;;  %v2916_v63 = vcombine.low %v1628_v35, %v4015_v7  ;;  %v2966_v7 = vcombine.low %v2300_v38, %v4043_v17  ;;  %v4113_v35 = vld [vmem:[#allocation2 + $0x48] sm:$0xf]  ;;  %v2961_v51 = vcombine.low %v4109_v30, %v2295_v24  ;;  %p3345_p3 = pnand %p3344_p2, %p3338_p13 }
 0x1f3   : > { %2009 = vrot.lane.b32.xlu0 %v1997_v57, %s3402_s14  ;;  %v2347_v57 = vshrl.u32 %v2956_v31, 16  ;;  %v1952_v31 = vor.u32 %v1951_v16, %v1947_v47 }
 0x1f4   : > { %v1772_v50 = vrot.slane %v2916_v63, 1  ;;  %v2444_v18 = vrot.slane %v2966_v7, 1 }
 0x1f6   : > { %2015 = vrot.lane.b32.xlu1 %v2000_v49, %s3402_s14  ;;  %v2352_v49 = vor.u32 %v2351_v52, %v2347_v57  ;;  %v4105_v57 = vld [vmem:[#allocation2 + $0x30] sm:$0xf] }
 0x1f7   : > { %1785 = vrot.lane.b32.xlu0 %v1771_v3, %s3402_s14  ;;  %v4077_v3 = vld [vmem:[#allocation2 + $0x18] sm:$0xf] }
 0x1f8   : > { %v2957_v36 = vcombine.low %v4077_v3, %v4079_v21 }
 0x1fa   : > { %2011 = vrot.lane.b32.xlu1 %v1998_v41, %s3402_s14  ;;  %v4086_v41 = vld [vmem:[#allocation2 + $0x28] sm:$0xf]  ;;  %v2356_v14 = vshll.u32 %v2957_v36, 16  ;;  %v2354_v56 = vshrl.u32 %v2957_v36, 16  ;;  %v2297_v36 = vld [vmem:[#allocation2 + $0x4c] sm:$0x1] }
 0x1fb   : > { %1965 = vrot.lane.b32.xlu0 %v1945_v44, %s3400_s19  ;;  %v4093_v44 = vld [vmem:[#allocation2 + $0x44] sm:$0x1]  ;;  %v2959_v25 = vcombine.low %v4086_v41, %v4088_v58 }
 0x1fc   : > { %v2962_v28 = vcombine.low %v4091_v43, %v4093_v44  ;;  %v2358_v13 = vrot.slane %v2356_v14, 1 }
 0x1fd   : > { %v2368_v17 = vshrl.u32 %v2959_v25, 16 }
 0x1fe   : > { %1739 = vrot.lane.b32.xlu1 %v1724_v34, %s3400_s19  ;;  %v1712_v34 = vshrl.u32 %v2907_v22, 16  ;;  %v2391_v1 = vshll.u32 %v2962_v28, 16  ;;  %v2359_v16 = vor.u32 %v2358_v13, %v2354_v56  ;;  %v2389_v33 = vshrl.u32 %v2962_v28, 16 }
 0x1ff   : > { %1961 = vrot.lane.b32.xlu0 %v1931_v2, %s3400_s19  ;;  %v2370_v2 = vshll.u32 %v2959_v25, 16  ;;  %v2963_v25 = vcombine.low %v4113_v35, %v2297_v36  ;;  %v2384_v28 = vshll.u32 %v2961_v51, 16  ;;  %v2382_v56 = vshrl.u32 %v2961_v51, 16 }
 0x200   : > { %v1717_v52 = vor.u32 %v1716_v6, %v1712_v34  ;;  %v2393_v22 = vrot.slane %v2391_v1, 1 }
 0x201   : > { %v2372_v15 = vrot.slane %v2370_v2, 1 }
 0x202   : > { %1735 = vrot.lane.b32.xlu1 %v1710_v9, %s3400_s19  ;;  %v2294_v9 = vld [vmem:[#allocation2 + $0x34] sm:$0x1]  ;;  %v2394_v59 = vor.u32 %v2393_v22, %v2389_v33  ;;  %v2305_v22 = vld [vmem:[#allocation2 + $0x48] sm:$0xe]  ;;  %v1726_v33 = vpop.permute.xlu0 %1725 }
 0x203   : > { %2402 = vrot.lane.b32.xlu0 %v2352_v49, %s3400_s19  ;;  %v2299_v49 = vld [vmem:[#allocation2 + $0x18] sm:$0xe]  ;;  %v2960_v47 = vcombine.low %v4105_v57, %v2294_v9 }
 0x204   : > { %v2965_v40 = vcombine.low %v2299_v49, %v4079_v21  ;;  %v2398_v21 = vshll.u32 %v2963_v25, 16  ;;  %v2303_v49 = vld [vmem:[#allocation2 + $0x38] sm:$0xe] }
 0x205   : > { %v2377_v14 = vshll.u32 %v2960_v47, 16  ;;  %v2375_v13 = vshrl.u32 %v2960_v47, 16  ;;  %v2969_v47 = vcombine.low %v2303_v49, %v2295_v24 }
 0x206   : > { %1967 = vrot.lane.b32.xlu1 %v1952_v31, %s3400_s19  ;;  %v2302_v31 = vld [vmem:[#allocation2 + $0x30] sm:$0xe] }
 0x207   : > { %2406 = vrot.lane.b32.xlu0 %v2366_v19, %s3400_s19  ;;  %v2373_v19 = vor.u32 %v2372_v15, %v2368_v17  ;;  %v2968_v63 = vcombine.low %v2302_v31, %v2294_v9  ;;  %v2379_v34 = vrot.slane %v2377_v14, 1  ;;  %v2396_v9 = vshrl.u32 %v2963_v25, 16 }
 0x208   : > { %v2447_v17 = vrot.slane %v2969_v47, 1 }
 0x209   : > { %v2446_v38 = vrot.slane %v2968_v63, 1  ;;  %v2380_v7 = vor.u32 %v2379_v34, %v2375_v13 }
 0x20a   : > { %1963 = vrot.lane.b32.xlu1 %v1938_v12, %s3400_s19  ;;  %v2301_v12 = vld [vmem:[#allocation2 + $0x28] sm:$0xe] }
 0x20b   : > { %2450 = vrot.lane.b32.xlu0 %v2442_v46, %s3402_s14  ;;  %v2443_v46 = vrot.slane %v2965_v40, 1  ;;  %v2967_v6 = vcombine.low %v2301_v12, %v4088_v58  ;;  %v2400_v58 = vrot.slane %v2398_v21, 1 }
 0x20d   : > { %v2445_v2 = vrot.slane %v2967_v6, 1 }
 0x20e   : > { %1787 = vrot.lane.b32.xlu1 %v1772_v50, %s3402_s14  ;;  %v2304_v50 = vld [vmem:[#allocation2 + $0x40] sm:$0xe] }
 0x20f   : > { %1737 = vrot.lane.b32.xlu0 %v1717_v52, %s3400_s19  ;;  %v2386_v52 = vrot.slane %v2384_v28, 1  ;;  %v2970_v1 = vcombine.low %v2304_v50, %v4093_v44  ;;  %v2971_v44 = vcombine.low %v2305_v22, %v2297_v36  ;;  %v3331_v22 = vld [vmem:[%s4326_s3 + $0x18] sm:$0xff]  }
 0x211   : > { %v2448_v15 = vrot.slane %v2970_v1, 1  ;;  %v2449_v31 = vrot.slane %v2971_v44, 1 }
 0x212   : > { %2404 = vrot.lane.b32.xlu1 %v2359_v16, %s3400_s19  ;;  %v2387_v16 = vor.u32 %v2386_v52, %v2382_v56 }
 0x213   : > { %2454 = vrot.lane.b32.xlu0 %v2444_v18, %s3402_s14  ;;  %v2401_v18 = vor.u32 %v2400_v58, %v2396_v9 }
 0x216   : > { %2408 = vrot.lane.b32.xlu1 %v2373_v19, %s3400_s19  ;;  %v4131_v19 = vpop.permute.xlu0 %1773 }
 0x217   : > { %2414 = vrot.lane.b32.xlu0 %v2394_v59, %s3400_s19 }
 0x21a   : > { %2452 = vrot.lane.b32.xlu1 %v2443_v46, %s3402_s14 }
 0x21b   : > { %2458 = vrot.lane.b32.xlu0 %v2446_v38, %s3402_s14 }
 0x21e   : > { %2456 = vrot.lane.b32.xlu1 %v2445_v2, %s3402_s14 }
 0x21f   : > { %2410 = vrot.lane.b32.xlu0 %v2380_v7, %s3400_s19 }
 0x222   : > { %2412 = vrot.lane.b32.xlu1 %v2387_v16, %s3400_s19 }
 0x223   : > { %2462 = vrot.lane.b32.xlu0 %v2448_v15, %s3402_s14 }
 0x226   : > { %2416 = vrot.lane.b32.xlu1 %v2401_v18, %s3400_s19  ;;  %s2999_s19 = sshll.u32 %s3466_s28, 9  ;;  %s4281_s28 = scalar_lea.sflag [#allocation4], %s269_s21 }
 0x22a   : > { %2460 = vrot.lane.b32.xlu1 %v2447_v17, %s3402_s14 }
 0x22e   : > { %2464 = vrot.lane.b32.xlu1 %v2449_v31, %s3402_s14  ;;  %s4272_s14 = scalar_lea.hbm %s4330_s7, %s2999_s19 }
 0x23e   : > { %v2006_v40 = vpop.permute.xlu0 %2005 }
 0x23f   : > { %v4133_v51 = vpop.permute.xlu1 %1779 }
 0x243   : > { %v2002_v59 = vpop.permute.xlu0 %2001 }
 0x248   : > { %v1776_v12 = vpop.permute.xlu1 %1775 }
 0x249   : > { %v4135_v63 = vpop.permute.xlu0 %1781 }
 0x24c   : > { %v2008_v24 = vpop.permute.xlu1 %2007 }
 0x24d   : > { %v4137_v14 = vpop.permute.xlu0 %1777 }
 0x250   : > { %v2004_v36 = vpop.permute.xlu1 %2003 }
 0x251   : > { %v1958_v25 = vpop.permute.xlu0 %1957 }
 0x252   : > { %v2025_v2 = vsel %vm480_vm3, %v3946_v0, %v1958_v25  ;;  %v3330_v0 = vld [vmem:[%s4326_s3 + $0x8] ss:$0 sps:$4 sm:$0xff]  }
 0x253   : > { %v2214_v18 = vsel %vm2103_vm12, %v3330_v0, 0 }
 0x254   : > { %v4139_v46 = vpop.permute.xlu1 %1731 }
 0x255   : > { %v1954_v6 = vpop.permute.xlu0 %1953 }
 0x256   : > { %v2019_v13 = vsel %vm480_vm3, %v3967_v10, %v1954_v6 }
 0x257   : > { %v2042_v9 = vsel %vm1813_vm13, %v2019_v13, %v2002_v59 }
 0x258   : > { %v1728_v28 = vpop.permute.xlu1 %1727 }
 0x259   : > { %v4141_v38 = vpop.permute.xlu0 %1733  ;;  %v1794_v6 = vsel %vm480_vm3, %v3974_v20, %v1728_v28 }
 0x25c   : > { %v1960_v34 = vpop.permute.xlu1 %1959 }
 0x25d   : > { %v1730_v21 = vpop.permute.xlu0 %1729  ;;  %v2028_v50 = vsel %vm480_vm3, %v3982_v48, %v1960_v34  ;;  %v2046_v48 = vsel %vm1813_vm13, %v2025_v2, %v2006_v40  ;;  %v1791_v2 = vsel %vm480_vm3, %v3875_v42, %v1726_v33 }
 0x25e   : > { %v2048_v7 = vsel %vm1813_vm13, %v2028_v50, %v2008_v24 }
 0x25f   : > { %v2937_v10 = vcombine.low %v2046_v48, %v2048_v7 }
 0x260   : > { %v1956_v52 = vpop.permute.xlu1 %1955 }
 0x261   : > { %v2022_v1 = vsel %vm480_vm3, %v3990_v54, %v1956_v52  ;;  %v2014_v56 = vpop.permute.xlu0 %2013 }
 0x262   : > { %v2044_v58 = vsel %vm1813_vm13, %v2022_v1, %v2004_v36 }
 0x263   : > { %v2936_v16 = vcombine.low %v2042_v9, %v2044_v58 }
 0x264   : > { %v1784_v15 = vpop.permute.xlu1 %1783 }
 0x265   : > { %3082 = vmatprep.mubr.msk.bf16.mxu1 %vm2090_vm14, %v2936_v16  ;;  %v2010_v49 = vpop.permute.xlu0 %2009  ;;  %v1803_v16 = vsel %vm480_vm3, %v3978_v26, %v4141_v38 }
 0x266   : > { %3083 = vmatmul.mubr.msk.bf16.vlgmr.msra.gmra.mrb[4].mxu1 %vm2090_vm14, %v2937_v10 }
 0x267   : > { %3091 = vmatpush3.bf16.msra.mxu1 %v4067_v29 }
 0x268   : > { %v2016_v54 = vpop.permute.xlu1 %2015  ;;  %3178 = vmatprep.subr.msk.bf16.mxu1 %vm2103_vm12, %v3330_v0  ;;  %v1823_v0 = vsel %vm1813_vm13, %v1803_v16, %v4135_v63 }
 0x269   : > { %v1786_v47 = vpop.permute.xlu0 %1785 }
 0x26b   : > { %3093 = vmatpush3.bf16.msra.mxu1 %v2214_v18 }
 0x26c   : > { %v2012_v44 = vpop.permute.xlu1 %2011  ;;  %3102 = vmatprep.subr.bf16.mxu1 %v3331_v22 }
 0x26d   : > { %v1966_v17 = vpop.permute.xlu0 %1965 }
 0x26e   : > { %v2037_v50 = vsel %vm480_vm3, %v4006_v32, %v1966_v17  ;;  %v1815_v32 = vsel %vm1813_vm13, %v1791_v2, %v4131_v19  ;;  %v1800_v19 = vsel %vm480_vm3, %v3953_v11, %v4139_v46  ;;  %v3332_v11 = vld [vmem:[%s4326_s3 + $0x20] ss:$0 sps:$4 sm:$0xff]  }
 0x26f   : > { %v2552_v63 = vsel %vm2103_vm12, %v3332_v11, 0 }
 0x270   : > { %v1740_v31 = vpop.permute.xlu1 %1739 }
 0x271   : > { %v1962_v40 = vpop.permute.xlu0 %1961  ;;  %v1812_v18 = vsel %vm480_vm3, %v4013_v5, %v1740_v31 }
 0x272   : > { %v2031_v34 = vsel %vm480_vm3, %v4018_v53, %v1962_v40  ;;  %v2054_v53 = vsel %vm1813_vm13, %v2037_v50, %v2014_v56 }
 0x273   : > { %v2050_v20 = vsel %vm1813_vm13, %v2031_v34, %v2010_v49 }
 0x274   : > { %v1736_v59 = vpop.permute.xlu1 %1735 }
 0x275   : > { %v2403_v24 = vpop.permute.xlu0 %2402 }
 0x278   : > { %v1968_v36 = vpop.permute.xlu1 %1967 }
 0x279   : > { %v4166_v29 = vpop.permute.xlu0 %2406  ;;  %v2040_v25 = vsel %vm480_vm3, %v4034_v27, %v1968_v36  ;;  %v1817_v27 = vsel %vm1813_vm13, %v1794_v6, %v1776_v12  ;;  %v1806_v12 = vsel %vm480_vm3, %v4021_v55, %v1736_v59  ;;  %v1821_v55 = vsel %vm1813_vm13, %v1800_v19, %v4133_v51 }
 0x27a   : > { %v2056_v52 = vsel %vm1813_vm13, %v2040_v25, %v2016_v54  ;;  %v2946_v33 = vcombine.low %v1815_v32, %v1817_v27 }
 0x27b   : > { %v2939_v58 = vcombine.low %v2054_v53, %v2056_v52 }
 0x27c   : > { %v1964_v13 = vpop.permute.xlu1 %1963 }
 0x27d   : > { %v2034_v7 = vsel %vm480_vm3, %v4055_v60, %v1964_v13  ;;  %v2451_v1 = vpop.permute.xlu0 %2450  ;;  %v1797_v60 = vsel %vm480_vm3, %v3986_v39, %v1730_v21  ;;  %v1825_v21 = vsel %vm1813_vm13, %v1806_v12, %v1784_v15 }
 0x27e   : > { %v2052_v28 = vsel %vm1813_vm13, %v2034_v7, %v2012_v44  ;;  %v1819_v10 = vsel %vm1813_vm13, %v1797_v60, %v4137_v14  ;;  %v2948_v46 = vcombine.low %v1823_v0, %v1825_v21  ;;  %v2468_v44 = vsel %vm480_vm3, %v4028_v23, %v2403_v24 }
 0x27f   : > { %v2938_v9 = vcombine.low %v2050_v20, %v2052_v28  ;;  %v2947_v49 = vcombine.low %v1819_v10, %v1821_v55  ;;  %v2491_v17 = vsel %vm1813_vm13, %v2468_v44, %v2451_v1  ;;  %v2474_v23 = vsel %vm480_vm3, %v4041_v37, %v4166_v29  ;;  %v2832_v28 = vld [vmem:[%s4329_s6] ss:$0 sm:$0xff] }
 0x280   : > { %v1788_v42 = vpop.permute.xlu1 %1787  ;;  %v995_v53 = vadd.f32 %v2832_v28, %v3898_v45  ;;  %v1006_v32 = vadd.f32 %v3900_v62, %v2832_v28 }
 0x281   : > { %3086 = vmatprep.mubr.msk.bf16.mxu1 %vm2090_vm14, %v2938_v9  ;;  %v1738_v48 = vpop.permute.xlu0 %1737  ;;  %v2985_v9 = vld [vmem:[%s4327_s4] ss:$0 sm:$0xff] }
 0x282   : > { %3087 = vmatmul.mubr.msk.bf16.gmra.mrb[0].mxu1 %vm2090_vm14, %v2939_v58  ;;  %v1809_v26 = vsel %vm480_vm3, %v4070_v4, %v1738_v48 }
 0x283   : > { %3094 = vmatprep.mubr.msk.bf16.mxu1 %vm2090_vm14, %v2946_v33  ;;  %v1827_v15 = vsel %vm1813_vm13, %v1809_v26, %v1786_v47  ;;  %v998_v33 = vadd.f32 %v2832_v28, %v3902_v8 }
 0x284   : > { %v2405_v56 = vpop.permute.xlu1 %2404 }
 0x285   : > { %v2455_v39 = vpop.permute.xlu0 %2454  ;;  %v2471_v38 = vsel %vm480_vm3, %v4077_v3, %v2405_v56 }
 0x286   : > { %v2495_v31 = vsel %vm1813_vm13, %v2474_v23, %v2455_v39 }
 0x288   : > { %v2409_v54 = vpop.permute.xlu1 %2408 }
 0x289   : > { %v2415_v14 = vpop.permute.xlu0 %2414  ;;  %v2477_v5 = vsel %vm480_vm3, %v4086_v41, %v2409_v54 }
 0x28a   : > { %3095 = vmatmul.mubr.msk.bf16.vlgmr.msra.gmra.mrb[4].mxu1 %vm2090_vm14, %v2947_v49  ;;  %v2486_v7 = vsel %vm480_vm3, %v4091_v43, %v2415_v14  ;;  %v1003_v43 = vadd.f32 %v3896_v61, %v2832_v28 }
 0x28b   : > { %3098 = vmatprep.mubr.msk.bf16.mxu1 %vm2090_vm14, %v2948_v46  ;;  %3103 = vmatpush3.bf16.msra.mxu1 %v3331_v22  ;;  %v1829_v22 = vsel %vm1813_vm13, %v1812_v18, %v1788_v42 }
 0x28c   : > { %v2453_v51 = vpop.permute.xlu1 %2452  ;;  %3179 = vmatprep.subr.msk.bf16.mxu1 %vm2103_vm12, %v3332_v11  ;;  %v2949_v40 = vcombine.low %v1827_v15, %v1829_v22 }
 0x28d   : > { %v2493_v4 = vsel %vm1813_vm13, %v2471_v38, %v2453_v51  ;;  %v2459_v25 = vpop.permute.xlu0 %2458 }
 0x28e   : > { %v2975_v36 = vcombine.low %v2491_v17, %v2493_v4 }
 0x28f   : > { %3105 = vmatpush3.bf16.msra.mxu1 %v2552_v63 }
 0x290   : > { %v2457_v59 = vpop.permute.xlu1 %2456 }
 0x291   : > { %v2497_v47 = vsel %vm1813_vm13, %v2477_v5, %v2457_v59  ;;  %v2411_v24 = vpop.permute.xlu0 %2410 }
 0x292   : > { %3099 = vmatmul.mubr.msk.bf16.gmra.mrb[0].mxu1 %vm2090_vm14, %v2949_v40  ;;  %v2976_v6 = vcombine.low %v2495_v31, %v2497_v47  ;;  %v2480_v50 = vsel %vm480_vm3, %v4105_v57, %v2411_v24 }
 0x293   : > { %3106 = vmatprep.mubr.msk.bf16.mxu1 %vm2090_vm14, %v2975_v36  ;;  %v2499_v2 = vsel %vm1813_vm13, %v2480_v50, %v2459_v25 }
 0x294   : > { %v2413_v3 = vpop.permute.xlu1 %2412 }
 0x295   : > { %v2483_v41 = vsel %vm480_vm3, %v4109_v30, %v2413_v3  ;;  %v2463_v37 = vpop.permute.xlu0 %2462 }
 0x296   : > { %v2503_v27 = vsel %vm1813_vm13, %v2486_v7, %v2463_v37 }
 0x298   : > { %v2417_v34 = vpop.permute.xlu1 %2416 }
 0x299   : > { %v2489_v57 = vsel %vm480_vm3, %v4113_v35, %v2417_v34 }
 0x29a   : > { %3107 = vmatmul.mubr.msk.bf16.vlgmr.msra.gmra.mrb[4].mxu1 %vm2090_vm14, %v2976_v6 }
 0x29c   : > { %v2461_v13 = vpop.permute.xlu1 %2460 }
 0x29d   : > { %v2501_v52 = vsel %vm1813_vm13, %v2483_v41, %v2461_v13 }
 0x29e   : > { %v2977_v29 = vcombine.low %v2499_v2, %v2501_v52 }
 0x2a0   : > { %v2465_v1 = vpop.permute.xlu1 %2464  ;;  %3110 = vmatprep.mubr.msk.bf16.mxu1 %vm2090_vm14, %v2977_v29 }
 0x2a1   : > { %v2505_v30 = vsel %vm1813_vm13, %v2489_v57, %v2465_v1 }
 0x2a2   : > { %v2978_v20 = vcombine.low %v2503_v27, %v2505_v30 }
 0x2a4   : > { %3111 = vmatmul.mubr.msk.bf16.gmra.mrb[0].mxu1 %vm2090_vm14, %v2978_v20 }
 0x36d   : > { %v3108_v35 = vpop.f32.mrb[4].mxu1 }
 0x36e   : > { %v3117_v58 = vadd.f32 %v3108_v35, %v1003_v43  ;;  %v2588_v42 = vpop.f32.mrb[5].mxu1 }
 0x36f   : > { %v3120_v48 = vadd.f32 %v2588_v42, %v995_v53  ;;  %v3109_v60 = vpop.f32.mrb[6].mxu1 }
 0x370   : > { %v3118_v12 = vadd.f32 %v3117_v58, %v2985_v9  ;;  %v3123_v19 = vadd.f32 %v3109_v60, %v1006_v32  ;;  %v2591_v61 = vpop.f32.mrb[7].mxu1 }
 0x371   : > { %v3121_v56 = vadd.f32 %v3120_v48, %v2985_v9  ;;  %v3126_v45 = vadd.f32 %v2591_v61, %v998_v33 }
 0x372   : > { %v2652_v16 = vpack.c.bf16 %v3118_v12, %v3118_v12  ;;  %v3124_v10 = vadd.f32 %v3123_v19, %v2985_v9 }
 0x373   : > { %v2650_v39 = vpack.c.bf16 %v3121_v56, %v3121_v56  ;;  %v3127_v21 = vadd.f32 %v3126_v45, %v2985_v9 }
 0x374   : > { %2660 = vst.msk [vmem:[%s271_s29 + $0x8] sm:$0xf] %vm1382_vm5, %v2652_v16  ;;  %v2653_v62 = vpack.c.bf16 %v3124_v10, %v3124_v10 }
 0x375   : > { %2658 = vst.msk [vmem:[%s271_s29] sm:$0xf] %vm1382_vm5, %v2650_v39  ;;  %v2651_v55 = vpack.c.bf16 %v3127_v21, %v3127_v21 }
 0x376   : > { %2661 = vst.msk [vmem:[%s271_s29 + $0xc] sm:$0xf] %vm1382_vm5, %v2653_v62 }
 0x377   : > { %2659 = vst.msk [vmem:[%s271_s29 + $0x4] sm:$0xf] %vm1382_vm5, %v2651_v55  ;;  %v3112_v8 = vpop.f32.mrb[0].mxu1 }
 0x378   : > { %v3128_v0 = vadd.f32 %v3112_v8, %v2832_v28  ;;  %v2604_v49 = vpop.f32.mrb[1].mxu1 }
 0x379   : > { %v3130_v54 = vadd.f32 %v2832_v28, %v2604_v49  ;;  %v3113_v11 = vpop.f32.mrb[2].mxu1 }
 0x37a   : > { %v3129_v46 = vadd.f32 %v3128_v0, %v2985_v9  ;;  %v3132_v26 = vadd.f32 %v3113_v11, %v2832_v28  ;;  %v2607_v14 = vpop.f32.mrb[3].mxu1 }
 0x37b   : > { %v3131_v51 = vadd.f32 %v3130_v54, %v2985_v9  ;;  %v3134_v63 = vadd.f32 %v2832_v28, %v2607_v14 }
 0x37c   : > { %v2656_v38 = vpack.c.bf16 %v3129_v46, %v3129_v46  ;;  %v3133_v15 = vadd.f32 %v3132_v26, %v2985_v9 }
 0x37d   : > { %v2654_v18 = vpack.c.bf16 %v3131_v51, %v3131_v51  ;;  %v3135_v4 = vadd.f32 %v3134_v63, %v2985_v9 }
 0x37e   : > { %2664 = vst.msk [vmem:[%s271_s29 + $0x18] sm:$0xf] %vm1382_vm5, %v2656_v38  ;;  %v2657_v44 = vpack.c.bf16 %v3133_v15, %v3133_v15 }
 0x37f   : > { %2662 = vst.msk [vmem:[%s271_s29 + $0x10] sm:$0xf] %vm1382_vm5, %v2654_v18  ;;  %v2655_v22 = vpack.c.bf16 %v3135_v4, %v3135_v4 }
 0x380   : > { %2665 = vst.msk [vmem:[%s271_s29 + $0x1c] sm:$0xf] %vm1382_vm5, %v2657_v44 }
 0x381   : > { %2663 = vst.msk [vmem:[%s271_s29 + $0x14] sm:$0xf] %vm1382_vm5, %v2655_v22 }
 0x382   : > { %3348 = shalt.err (!%p3345_p3)
}
 0x383   : > { %s3349_s21 = scalar_lea.hbm %s4272_s14, 512  ;;  %s3353_s29 = scalar_lea.hbm %s4330_s7, 1024 }
 0x384   : > { %p3350_p4 = scmp.ne.s32.totalorder %s4272_s14, %s3349_s21  ;;  %p3354_p9 = scmp.lt.u32.totalorder %s4272_s14, %s4330_s7 }
 0x385   : > { %p3355_p10 = scmp.lt.u32.totalorder %s3353_s29, %s3349_s21  ;;  %p3357_p12 = scmp.lt.u32.totalorder %s3349_s21, %s4272_s14 }
 0x386   : > { %p3351_p7 = pnand %p3350_p4, %p3483_p5 }
 0x387   : > { %p3356_p11 = por %p3355_p10, %p3354_p9 }
 0x388   : > { %p3352_p8 = pneg %p3351_p7 }
 0x389   : > { %p3358_p13 = por %p3357_p12, %p3356_p11 }
 0x38b   : > { %p3359_p0 = pnand %p3358_p13, %p3352_p8 }
 0x38d   : > { %3362 = shalt.err (!%p3359_p0)
}
 0x38e   : > { %s3404_s13 = smov 64  }
 0x38f   : > { %3181 = dma.vmem_to_hbm [thread:$0]  (%p3483_p5), %s4275_s8, 512, %s4272_s14, %s4281_s28, %s3404_s13, %s3404_s13, %s3399_s18  }
 0x390 PF: > { %p3187_p1 = scmp.ge.s32.totalorder %s3397_s27, 2  ;;  %s2695_s15 = sand.u32 1, %s3385_s24  }
 0x391   : > { %s2696_s16 = scalar_lea.sflag [#allocation4], %s2695_s15 }
 0x392   : > { %p3184_p2 = pnand %p3187_p1, %p3487_p6 }
 0x394   : > { %3380 = dma.done.wait (!%p3184_p2), %s2696_s16, 512  }
 0x395   : > { %3382 = vsyncadd (!%p3184_p2), %s2696_s16, 4294966784  ;;  %p17_p3 = scmp.ge.s32.totalorder %s3470_s30, 4   ;;  %s4339_s24 = smov %s3389_s25 }
 0x396   : > { %s4340_s25 = smov %s3393_s26  ;;  %s4341_s26 = smov %s3481_s10 }
 0x397   : > { %s4342_s27 = smov %s3470_s30  ;;  %19 = sbr.rel (!%p17_p3) target bundleno = 3 (0x3), region = 95 }
 0x39e   :  { %2701 = vsyncpa [#allocation4], 1 }
 0x39f   :  { %2703 = vsyncpa [#allocation4 + $0x1], 1 }

</bundles_post_ra>
